<compile_context>
chip_gen: v5e
topology: v5e:2x2
jax: 0.10.0
libtpu: 0.0.40
codegen_flags: <defaults>
</compile_context>

<pallas_src>
import jax
import jax.numpy as jnp
from jax.experimental import pallas as pl
from jax.experimental.pallas import tpu as pltpu


def _round_up(n, m):
    return ((n + m - 1) // m) * m


def _make_kernel(layer_dims, bias_offsets):
    """Build the fused-MLP kernel body.

    layer_dims   = (in_features, h1, h2, h3, out_features)
    bias_offsets = 128-aligned lane offset of each layer's bias inside the
                   concatenated bias row.
    """
    n_layers = len(layer_dims) - 1

    def kernel(x_ref, *refs):
        w_refs = refs[:n_layers]
        b_ref = refs[n_layers]
        o_ref = refs[n_layers + 1]

        # bf16 into the MXU, f32 accumulate; bias + ReLU epilogue in f32.
        h = x_ref[...].astype(jnp.bfloat16)
        for i in range(n_layers):
            off = bias_offsets[i]
            fan_out = layer_dims[i + 1]
            z = jnp.dot(h, w_refs[i][...], preferred_element_type=jnp.float32)
            z = z + b_ref[:, off:off + fan_out]
            if i < n_layers - 1:
                h = jnp.maximum(z, 0.0).astype(jnp.bfloat16)
            else:
                o_ref[...] = z      # final Linear: no activation

    return kernel


def init_params(key, in_features=784, h1=390, h2=195, h3=97, out_features=10):
    """Deterministic f32 parameter init (uniform, PyTorch-default scale).

    Weights stored as (in_features, out_features) — transpose of nn.Linear's
    (out, in) — so each layer is x @ W + b.
    """
    dims = [(in_features, h1), (h1, h2), (h2, h3), (h3, out_features)]
    params = []
    for i, (fan_in, fan_out) in enumerate(dims):
        kw, kb = jax.random.split(jax.random.fold_in(key, i))
        bound = 1.0 / (fan_in ** 0.5)
        w = jax.random.uniform(kw, (fan_in, fan_out), jnp.float32, -bound, bound)
        b = jax.random.uniform(kb, (1, fan_out), jnp.float32, -bound, bound)
        params.append((w, b))
    return params


def prepare_params(params_f32):
    """One-time prep: weights -> bf16 at native shapes; biases concatenated
    into one f32 row with 128-aligned segment starts (padding lanes are zero
    and never read by the kernel)."""
    ws = [w.astype(jnp.bfloat16) for w, _ in params_f32]

    offsets = []
    off = 0
    for _, b in params_f32:
        offsets.append(off)
        off += _round_up(b.shape[-1], 128)
    total = _round_up(off, 128)

    bcat = jnp.zeros((1, total), jnp.float32)
    for (_, b), o in zip(params_f32, offsets):
        bcat = bcat.at[:, o:o + b.shape[-1]].set(b.reshape(1, -1))

    layer_dims = tuple([params_f32[0][0].shape[0]] +
                       [w.shape[1] for w, _ in params_f32])
    return ws, bcat, tuple(offsets), layer_dims


def mlp_forward(x, ws, bcat, bias_offsets, layer_dims):
    """x: (B, in_features) f32. Returns (B, out_features) f32."""
    B = x.shape[0]
    out_features = layer_dims[-1]
    kernel = _make_kernel(layer_dims, bias_offsets)

    # Tiny problem (~0.8 MB of weights): everything resident in VMEM, single
    # grid-less invocation with full-array blocks.
    vmem = pl.BlockSpec(memory_space=pltpu.MemorySpace.VMEM)
    return pl.pallas_call(
        kernel,
        out_shape=jax.ShapeDtypeStruct((B, out_features), jnp.float32),
        in_specs=[vmem] * (1 + len(ws) + 1),
        out_specs=vmem,
    )(x, *ws, bcat)


def reference_forward_f32(x, params_f32):
    h = x
    for i, (w, b) in enumerate(params_f32):
        h = h @ w + b
        if i < len(params_f32) - 1:
            h = jnp.maximum(h, 0.0)
    return h


def reference_forward_bf16(x, params_f32):
    """Plain-JAX reference mirroring the kernel's bf16-in / f32-accumulate path."""
    h = x.astype(jnp.bfloat16)
    for i, (w, b) in enumerate(params_f32):
        h = jnp.dot(h, w.astype(jnp.bfloat16),
                    preferred_element_type=jnp.float32) + b
        if i < len(params_f32) - 1:
            h = jnp.maximum(h, 0.0).astype(jnp.bfloat16)
    return h


if __name__ == "__main__":
    key = jax.random.PRNGKey(0)
    kx, kp = jax.random.split(key)

    batch = 16            # bf16-sublane friendly; no padding needed anywhere
    in_features = 784
    out_features = 10

    x = jax.random.normal(kx, (batch, in_features), jnp.float32)
    params_f32 = init_params(kp, in_features=in_features,
                             out_features=out_features)
    ws, bcat, bias_offsets, layer_dims = prepare_params(params_f32)

    out = mlp_forward(x, ws, bcat, bias_offsets, layer_dims)
    out = jax.block_until_ready(out)
    assert out.shape == (batch, out_features)

    # Tight check against a bf16-emulated reference (same numeric path).
    ref_bf16 = reference_forward_bf16(x, params_f32)
    assert jnp.allclose(out, ref_bf16, atol=2e-2, rtol=2e-2), \
        "mismatch vs bf16-emulated reference"

    # Loose sanity check against the full-precision f32 reference.
    ref_f32 = reference_forward_f32(x, params_f32)
    assert jnp.allclose(out, ref_f32, atol=1.5e-1, rtol=1.5e-1), \
        "mismatch vs f32 reference"

    print("KERNEL_OK")
</pallas_src>

<mosaic_0001>
module attributes {stable_mosaic.version = 11 : i64} {
  func.func @kernel(%arg0: memref<16x784xf32, #tpu.memory_space<vmem>>, %arg1: memref<784x390xbf16, #tpu.memory_space<vmem>>, %arg2: memref<390x195xbf16, #tpu.memory_space<vmem>>, %arg3: memref<195x97xbf16, #tpu.memory_space<vmem>>, %arg4: memref<97x10xbf16, #tpu.memory_space<vmem>>, %arg5: memref<1x1024xf32, #tpu.memory_space<vmem>>, %arg6: memref<16x10xf32, #tpu.memory_space<vmem>>) attributes {dimension_semantics = [], scalar_prefetch = 0 : i64, scratch_operands = 0 : i64, tpu.core_type = #tpu.core_type<tc>} {
    %c0 = arith.constant 0 : index
    %c0_0 = arith.constant 0 : index
    %0 = vector.load %arg0[%c0, %c0_0] : memref<16x784xf32, #tpu.memory_space<vmem>>, vector<16x784xf32>
    %1 = arith.truncf %0 : vector<16x784xf32> to vector<16x784xbf16>
    %c0_1 = arith.constant 0 : index
    %c0_2 = arith.constant 0 : index
    %2 = vector.load %arg1[%c0_1, %c0_2] : memref<784x390xbf16, #tpu.memory_space<vmem>>, vector<784x390xbf16>
    %cst = arith.constant dense<0.000000e+00> : vector<16x390xf32>
    %3 = tpu.matmul %1, %2, %cst {dimension_numbers = #tpu.dot_dimension_numbers<[1], [0], [0], [1], [0, 0, 1, 1], [], []>} : vector<16x784xbf16>, vector<784x390xbf16>, vector<16x390xf32> -> vector<16x390xf32>
    %c0_3 = arith.constant 0 : index
    %c0_4 = arith.constant 0 : index
    %4 = vector.load %arg5[%c0_3, %c0_4] : memref<1x1024xf32, #tpu.memory_space<vmem>>, vector<1x390xf32>
    %5 = vector.broadcast %4 : vector<1x390xf32> to vector<16x390xf32>
    %6 = arith.addf %3, %5 : vector<16x390xf32>
    %cst_5 = arith.constant 0.000000e+00 : f32
    %7 = vector.broadcast %cst_5 : f32 to vector<16x390xf32>
    %8 = arith.maximumf %6, %7 : vector<16x390xf32>
    %9 = arith.truncf %8 : vector<16x390xf32> to vector<16x390xbf16>
    %c0_6 = arith.constant 0 : index
    %c0_7 = arith.constant 0 : index
    %10 = vector.load %arg2[%c0_6, %c0_7] : memref<390x195xbf16, #tpu.memory_space<vmem>>, vector<390x195xbf16>
    %cst_8 = arith.constant dense<0.000000e+00> : vector<16x195xf32>
    %11 = tpu.matmul %9, %10, %cst_8 {dimension_numbers = #tpu.dot_dimension_numbers<[1], [0], [0], [1], [0, 0, 1, 1], [], []>} : vector<16x390xbf16>, vector<390x195xbf16>, vector<16x195xf32> -> vector<16x195xf32>
    %c0_9 = arith.constant 0 : index
    %c512 = arith.constant 512 : index
    %12 = vector.load %arg5[%c0_9, %c512] : memref<1x1024xf32, #tpu.memory_space<vmem>>, vector<1x195xf32>
    %13 = vector.broadcast %12 : vector<1x195xf32> to vector<16x195xf32>
    %14 = arith.addf %11, %13 : vector<16x195xf32>
    %cst_10 = arith.constant 0.000000e+00 : f32
    %15 = vector.broadcast %cst_10 : f32 to vector<16x195xf32>
    %16 = arith.maximumf %14, %15 : vector<16x195xf32>
    %17 = arith.truncf %16 : vector<16x195xf32> to vector<16x195xbf16>
    %c0_11 = arith.constant 0 : index
    %c0_12 = arith.constant 0 : index
    %18 = vector.load %arg3[%c0_11, %c0_12] : memref<195x97xbf16, #tpu.memory_space<vmem>>, vector<195x97xbf16>
    %cst_13 = arith.constant dense<0.000000e+00> : vector<16x97xf32>
    %19 = tpu.matmul %17, %18, %cst_13 {dimension_numbers = #tpu.dot_dimension_numbers<[1], [0], [0], [1], [0, 0, 1, 1], [], []>} : vector<16x195xbf16>, vector<195x97xbf16>, vector<16x97xf32> -> vector<16x97xf32>
    %c0_14 = arith.constant 0 : index
    %c768 = arith.constant 768 : index
    %20 = vector.load %arg5[%c0_14, %c768] : memref<1x1024xf32, #tpu.memory_space<vmem>>, vector<1x97xf32>
    %21 = vector.broadcast %20 : vector<1x97xf32> to vector<16x97xf32>
    %22 = arith.addf %19, %21 : vector<16x97xf32>
    %cst_15 = arith.constant 0.000000e+00 : f32
    %23 = vector.broadcast %cst_15 : f32 to vector<16x97xf32>
    %24 = arith.maximumf %22, %23 : vector<16x97xf32>
    %25 = arith.truncf %24 : vector<16x97xf32> to vector<16x97xbf16>
    %c0_16 = arith.constant 0 : index
    %c0_17 = arith.constant 0 : index
    %26 = vector.load %arg4[%c0_16, %c0_17] : memref<97x10xbf16, #tpu.memory_space<vmem>>, vector<97x10xbf16>
    %cst_18 = arith.constant dense<0.000000e+00> : vector<16x10xf32>
    %27 = tpu.matmul %25, %26, %cst_18 {dimension_numbers = #tpu.dot_dimension_numbers<[1], [0], [0], [1], [0, 0, 1, 1], [], []>} : vector<16x97xbf16>, vector<97x10xbf16>, vector<16x10xf32> -> vector<16x10xf32>
    %c0_19 = arith.constant 0 : index
    %c896 = arith.constant 896 : index
    %28 = vector.load %arg5[%c0_19, %c896] : memref<1x1024xf32, #tpu.memory_space<vmem>>, vector<1x10xf32>
    %29 = vector.broadcast %28 : vector<1x10xf32> to vector<16x10xf32>
    %30 = arith.addf %27, %29 : vector<16x10xf32>
    %c0_20 = arith.constant 0 : index
    %c0_21 = arith.constant 0 : index
    %31 = vector.load %arg6[%c0_20, %c0_21] : memref<16x10xf32, #tpu.memory_space<vmem>>, vector<16x10xf32>
    tpu.vector_store %arg6[%c0_20, %c0_21], %30 {strides = array<i32>} : memref<16x10xf32, #tpu.memory_space<vmem>>, vector<16x10xf32>,
    return
  }
}

</mosaic_0001>

<bundles_post_ra>
// kernel: tpu_custom_call.1
= control target key start
LH: loop header
LB: loop body
LE: loop exit
PB: predicated region body
PF: predicated region fallthrough
CT: control target
= control target key end

     0   :  { %vm1232_vm0 = vcmask 130048   ;;  %s5357_s0 = inlined_call_operand.vmem [shape: f32[16,784], index: 0, kind: input, shape index: {}]   ;;  %s5358_s1 = inlined_call_operand.vmem [shape: bf16[784,390], index: 1, kind: input, shape index: {}]   ;;  %s5359_s2 = inlined_call_operand.vmem [shape: bf16[390,195], index: 2, kind: input, shape index: {}]   ;;  %s5360_s3 = inlined_call_operand.vmem [shape: bf16[195,97], index: 3, kind: input, shape index: {}]   ;;  %s5361_s4 = inlined_call_operand.vmem [shape: bf16[97,10], index: 4, kind: input, shape index: {}]   ;;  %s5362_s5 = inlined_call_operand.vmem [shape: f32[1,1024], index: 5, kind: input, shape index: {}]   ;;  %s5363_s6 = inlined_call_operand.hbm [shape: f32[16,10], index: 6, kind: output, shape index: {}]  }
   0x1   :  { %v2429_v0 = vld [vmem:[%s5358_s1 + $0xe0] sm:$0xf]  ;;  %v3401_v1 = vld [vmem:[%s5358_s1 + $0xec] sm:$0xf0] }
   0x2   :  { %v2557_v2 = vld [vmem:[%s5358_s1 + $0x1e0] sm:$0xf]  ;;  %v2430_v3 = vor.u32 %v3401_v1, %v2429_v0  ;;  %v3433_v4 = vld [vmem:[%s5358_s1 + $0x1ec] sm:$0xf0] }
   0x3   :  { %v2685_v5 = vld [vmem:[%s5358_s1 + $0x2e0] sm:$0xf]  ;;  %v3465_v6 = vld [vmem:[%s5358_s1 + $0x2ec] sm:$0xf0]  ;;  %v2558_v7 = vor.u32 %v3433_v4, %v2557_v2 }
   0x4   :  { %v2686_v8 = vor.u32 %v3465_v6, %v2685_v5  ;;  %v2813_v9 = vld [vmem:[%s5358_s1 + $0x3e0] sm:$0xf]  ;;  %v3497_v10 = vld [vmem:[%s5358_s1 + $0x3ec] sm:$0xf0]  ;;  %1236 = vmatpush.bf16.msra.mxu0 %v2430_v3 }
   0x5   :  { %v2413_v11 = vld [vmem:[%s5358_s1 + $0xc0] sm:$0xf]  ;;  %v2814_v12 = vor.u32 %v3497_v10, %v2813_v9  ;;  %v3397_v13 = vld [vmem:[%s5358_s1 + $0xcc] sm:$0xf0]  ;;  %1250 = vmatpush.bf16.msra.mxu1 %v2558_v7 }
   0x6   :  { %v2541_v14 = vld [vmem:[%s5358_s1 + $0x1c0] sm:$0xf]  ;;  %v3429_v15 = vld [vmem:[%s5358_s1 + $0x1cc] sm:$0xf0]  ;;  %1264 = vmatpush.bf16.msra.mxu2 %v2686_v8  ;;  %v2414_v16 = vor.u32 %v3397_v13, %v2413_v11 }
   0x7   :  { %v2542_v17 = vor.u32 %v3429_v15, %v2541_v14  ;;  %v2669_v18 = vld [vmem:[%s5358_s1 + $0x2c0] sm:$0xf]  ;;  %v3461_v19 = vld [vmem:[%s5358_s1 + $0x2cc] sm:$0xf0]  ;;  %1278 = vmatpush.bf16.msra.mxu3 %v2814_v12 }
   0x8   :  { %v2797_v20 = vld [vmem:[%s5358_s1 + $0x3c0] sm:$0xf]  ;;  %v2670_v21 = vor.u32 %v3461_v19, %v2669_v18  ;;  %v3493_v22 = vld [vmem:[%s5358_s1 + $0x3cc] sm:$0xf0]  ;;  %1237 = vmatpush.bf16.msra.mxu0 %v2414_v16 }
   0x9   :  { %v2397_v23 = vld [vmem:[%s5358_s1 + $0xa0] sm:$0xf]  ;;  %v3393_v24 = vld [vmem:[%s5358_s1 + $0xac] sm:$0xf0]  ;;  %v2798_v25 = vor.u32 %v3493_v22, %v2797_v20  ;;  %1251 = vmatpush.bf16.msra.mxu1 %v2542_v17 }
   0xa   :  { %v2525_v26 = vld [vmem:[%s5358_s1 + $0x1a0] sm:$0xf]  ;;  %v3425_v27 = vld [vmem:[%s5358_s1 + $0x1ac] sm:$0xf0]  ;;  %v2398_v29 = vor.u32 %v3393_v24, %v2397_v23  ;;  %1265 = vmatpush.bf16.msra.mxu2 %v2670_v21 }
   0xb   :  { %v2653_v28 = vld [vmem:[%s5358_s1 + $0x2a0] sm:$0xf]  ;;  %v3457_v30 = vld [vmem:[%s5358_s1 + $0x2ac] sm:$0xf0]  ;;  %v2526_v33 = vor.u32 %v3425_v27, %v2525_v26  ;;  %1279 = vmatpush.bf16.msra.mxu3 %v2798_v25 }
   0xc   :  { %v2781_v31 = vld [vmem:[%s5358_s1 + $0x3a0] sm:$0xf]  ;;  %v3489_v32 = vld [vmem:[%s5358_s1 + $0x3ac] sm:$0xf0]  ;;  %v2654_v34 = vor.u32 %v3457_v30, %v2653_v28  ;;  %1238 = vmatpush.bf16.msra.mxu0 %v2398_v29 }
   0xd   :  { %v2381_v35 = vld [vmem:[%s5358_s1 + $0x80] sm:$0xf]  ;;  %v3389_v36 = vld [vmem:[%s5358_s1 + $0x8c] sm:$0xf0]  ;;  %v2782_v38 = vor.u32 %v3489_v32, %v2781_v31  ;;  %1252 = vmatpush.bf16.msra.mxu1 %v2526_v33  ;;  %v3399_v32 = vld [vmem:[%s5358_s1 + $0xe4] sm:$0xf] }
   0xe   :  { %v2509_v37 = vld [vmem:[%s5358_s1 + $0x180] sm:$0xf]  ;;  %v3421_v39 = vld [vmem:[%s5358_s1 + $0x18c] sm:$0xf0]  ;;  %v2382_v44 = vor.u32 %v3389_v36, %v2381_v35  ;;  %1266 = vmatpush.bf16.msra.mxu2 %v2654_v34  ;;  %v2431_v33 = vld [vmem:[%s5358_s1 + $0xf0] sm:$0xf0] }
   0xf   :  { %v2637_v40 = vld [vmem:[%s5358_s1 + $0x280] sm:$0xf]  ;;  %v3453_v41 = vld [vmem:[%s5358_s1 + $0x28c] sm:$0xf0]  ;;  %v2510_v45 = vor.u32 %v3421_v39, %v2509_v37  ;;  %1280 = vmatpush.bf16.msra.mxu3 %v2782_v38  ;;  %v34_v36 = vld [vmem:[%s5357_s0 + $0x48] sm:$0xff] }
  0x10   :  { %v2765_v42 = vld [vmem:[%s5358_s1 + $0x380] sm:$0xf]  ;;  %v3485_v43 = vld [vmem:[%s5358_s1 + $0x38c] sm:$0xf0]  ;;  %v2638_v46 = vor.u32 %v3453_v41, %v2637_v40  ;;  %1239 = vmatpush.bf16.msra.mxu0 %v2382_v44  ;;  %v3431_v41 = vld [vmem:[%s5358_s1 + $0x1e4] sm:$0xf] }
  0x11   :  { %v2365_v47 = vld [vmem:[%s5358_s1 + $0x60] sm:$0xf]  ;;  %v3385_v48 = vld [vmem:[%s5358_s1 + $0x6c] sm:$0xf0]  ;;  %v2766_v50 = vor.u32 %v3485_v43, %v2765_v42  ;;  %1253 = vmatpush.bf16.msra.mxu1 %v2510_v45  ;;  %v32_v43 = vld [vmem:[%s5357_s0 + $0x38] sm:$0xff] }
  0x12   :  { %v2493_v49 = vld [vmem:[%s5358_s1 + $0x160] sm:$0xf]  ;;  %v3417_v51 = vld [vmem:[%s5358_s1 + $0x16c] sm:$0xf0]  ;;  %v2366_v56 = vor.u32 %v3385_v48, %v2365_v47  ;;  %1267 = vmatpush.bf16.msra.mxu2 %v2638_v46  ;;  %v2559_v46 = vld [vmem:[%s5358_s1 + $0x1f0] sm:$0xf0] }
  0x13   :  { %v2621_v52 = vld [vmem:[%s5358_s1 + $0x260] sm:$0xf]  ;;  %v3449_v53 = vld [vmem:[%s5358_s1 + $0x26c] sm:$0xf0]  ;;  %v2494_v57 = vor.u32 %v3417_v51, %v2493_v49  ;;  %1281 = vmatpush.bf16.msra.mxu3 %v2766_v50  ;;  %v28_v47 = vld [vmem:[%s5357_s0 + $0x18] sm:$0xff]  ;;  %v2434_v50 = vor.u32 %v3399_v32, %v2431_v33 }
  0x14   :  { %v2749_v54 = vld [vmem:[%s5358_s1 + $0x360] sm:$0xf]  ;;  %v3481_v55 = vld [vmem:[%s5358_s1 + $0x36c] sm:$0xf0]  ;;  %v2622_v58 = vor.u32 %v3449_v53, %v2621_v52  ;;  %1240 = vmatpush.bf16.msra.mxu0 %v2366_v56 }
  0x15   :  { %v2349_v59 = vld [vmem:[%s5358_s1 + $0x40] sm:$0xf]  ;;  %v3381_v60 = vld [vmem:[%s5358_s1 + $0x4c] sm:$0xf0]  ;;  %v2750_v62 = vor.u32 %v3481_v55, %v2749_v54  ;;  %1254 = vmatpush.bf16.msra.mxu1 %v2494_v57  ;;  %v3395_v57 = vld [vmem:[%s5358_s1 + $0xc4] sm:$0xf] }
  0x16   :  { %v2477_v61 = vld [vmem:[%s5358_s1 + $0x140] sm:$0xf]  ;;  %v3413_v63 = vld [vmem:[%s5358_s1 + $0x14c] sm:$0xf0]  ;;  %v2350_v4 = vor.u32 %v3381_v60, %v2349_v59  ;;  %1268 = vmatpush.bf16.msra.mxu2 %v2622_v58  ;;  %v2415_v58 = vld [vmem:[%s5358_s1 + $0xd0] sm:$0xf0] }
  0x17   :  { %v2605_v0 = vld [vmem:[%s5358_s1 + $0x240] sm:$0xf]  ;;  %v3445_v1 = vld [vmem:[%s5358_s1 + $0x24c] sm:$0xf0]  ;;  %v2478_v6 = vor.u32 %v3413_v63, %v2477_v61  ;;  %1282 = vmatpush.bf16.msra.mxu3 %v2750_v62  ;;  %v26_v61 = vld [vmem:[%s5357_s0 + $0x8] sm:$0xff]  ;;  %v2562_v63 = vor.u32 %v3431_v41, %v2559_v46 }
  0x18   :  { %v2733_v2 = vld [vmem:[%s5358_s1 + $0x340] sm:$0xf]  ;;  %v3477_v3 = vld [vmem:[%s5358_s1 + $0x34c] sm:$0xf0]  ;;  %v2606_v7 = vor.u32 %v3445_v1, %v2605_v0  ;;  %1241 = vmatpush.bf16.msra.mxu0 %v2350_v4  ;;  %v3427_v1 = vld [vmem:[%s5358_s1 + $0x1c4] sm:$0xf]  ;;  %v2418_v4 = vor.u32 %v3395_v57, %v2415_v58 }
  0x19   :  { %v2333_v5 = vld [vmem:[%s5358_s1 + $0x20] sm:$0xf]  ;;  %v3377_v8 = vld [vmem:[%s5358_s1 + $0x2c] sm:$0xf0]  ;;  %v2734_v11 = vor.u32 %v3477_v3, %v2733_v2  ;;  %1255 = vmatpush.bf16.msra.mxu1 %v2478_v6  ;;  %v2543_v2 = vld [vmem:[%s5358_s1 + $0x1d0] sm:$0xf0] }
  0x1a   :  { %v2461_v9 = vld [vmem:[%s5358_s1 + $0x120] sm:$0xf]  ;;  %v3409_v10 = vld [vmem:[%s5358_s1 + $0x12c] sm:$0xf0]  ;;  %v2334_v18 = vor.u32 %v3377_v8, %v2333_v5  ;;  %1269 = vmatpush.bf16.msra.mxu2 %v2606_v7  ;;  %v38_v41 = vld [vmem:[%s5357_s0 + $0x68] sm:$0xff] }
  0x1b   :  { %v2589_v12 = vld [vmem:[%s5358_s1 + $0x220] sm:$0xf]  ;;  %v3441_v13 = vld [vmem:[%s5358_s1 + $0x22c] sm:$0xf0]  ;;  %v2462_v23 = vor.u32 %v3409_v10, %v2461_v9  ;;  %1283 = vmatpush.bf16.msra.mxu3 %v2734_v11  ;;  %v3391_v10 = vld [vmem:[%s5358_s1 + $0xa4] sm:$0xf] }
  0x1c   :  { %v2717_v14 = vld [vmem:[%s5358_s1 + $0x320] sm:$0xf]  ;;  %v3473_v15 = vld [vmem:[%s5358_s1 + $0x32c] sm:$0xf0]  ;;  %v2590_v24 = vor.u32 %v3441_v13, %v2589_v12  ;;  %1242 = vmatpush.bf16.msra.mxu0 %v2334_v18  ;;  %v2399_v11 = vld [vmem:[%s5358_s1 + $0xb0] sm:$0xf0]  ;;  %v2546_v12 = vor.u32 %v3427_v1, %v2543_v2 }
  0x1d   :  { %v2317_v16 = vld [vmem:[%s5358_s1] sm:$0xf]  ;;  %v3373_v17 = vld [vmem:[%s5358_s1 + $0xc] sm:$0xf0]  ;;  %v2718_v28 = vor.u32 %v3473_v15, %v2717_v14  ;;  %1256 = vmatpush.bf16.msra.mxu1 %v2462_v23  ;;  %v3423_v14 = vld [vmem:[%s5358_s1 + $0x1a4] sm:$0xf] }
  0x1e   :  { %v2445_v19 = vld [vmem:[%s5358_s1 + $0x100] sm:$0xf]  ;;  %v3405_v20 = vld [vmem:[%s5358_s1 + $0x10c] sm:$0xf0]  ;;  %v2318_v35 = vor.u32 %v3373_v17, %v2317_v16  ;;  %1270 = vmatpush.bf16.msra.mxu2 %v2590_v24  ;;  %v2527_v15 = vld [vmem:[%s5358_s1 + $0x1b0] sm:$0xf0]  ;;  %v2402_v17 = vor.u32 %v3391_v10, %v2399_v11 }
  0x1f   :  { %v2573_v21 = vld [vmem:[%s5358_s1 + $0x200] sm:$0xf]  ;;  %v3437_v22 = vld [vmem:[%s5358_s1 + $0x20c] sm:$0xf0]  ;;  %v2446_v39 = vor.u32 %v3405_v20, %v2445_v19  ;;  %1284 = vmatpush.bf16.msra.mxu3 %v2718_v28  ;;  %v2383_v23 = vld [vmem:[%s5358_s1 + $0x90] sm:$0xf0]  ;;  %v2530_v24 = vor.u32 %v3423_v14, %v2527_v15 }
  0x20   :  { %v2701_v25 = vld [vmem:[%s5358_s1 + $0x300] sm:$0xf]  ;;  %v3469_v26 = vld [vmem:[%s5358_s1 + $0x30c] sm:$0xf0]  ;;  %v2574_v40 = vor.u32 %v3437_v22, %v2573_v21  ;;  %1243 = vmatpush.bf16.msra.mxu0 %v2318_v35  ;;  %v3387_v22 = vld [vmem:[%s5358_s1 + $0x84] sm:$0xf] }
  0x21   :  { %v2941_v27 = vld [vmem:[%s5358_s1 + $0x4e0] sm:$0xf]  ;;  %v3529_v29 = vld [vmem:[%s5358_s1 + $0x4ec] sm:$0xf0]  ;;  %v2702_v44 = vor.u32 %v3469_v26, %v2701_v25  ;;  %1257 = vmatpush.bf16.msra.mxu1 %v2446_v39  ;;  %v3419_v26 = vld [vmem:[%s5358_s1 + $0x184] sm:$0xf] }
  0x22   :  { %v3069_v30 = vld [vmem:[%s5358_s1 + $0x5e0] sm:$0xf]  ;;  %v3561_v31 = vld [vmem:[%s5358_s1 + $0x5ec] sm:$0xf0]  ;;  %v2942_v45 = vor.u32 %v3529_v29, %v2941_v27  ;;  %1271 = vmatpush.bf16.msra.mxu2 %v2574_v40  ;;  %v2511_v27 = vld [vmem:[%s5358_s1 + $0x190] sm:$0xf0]  ;;  %v2386_v29 = vor.u32 %v3387_v22, %v2383_v23 }
  0x23   :  { %v27_v34 = vld [vmem:[%s5357_s0 + $0x10] sm:$0xff]  ;;  %v3085_v37 = vld [vmem:[%s5358_s1 + $0x600] sm:$0xf]  ;;  %v3070_v49 = vor.u32 %v3561_v31, %v3069_v30  ;;  %1285 = vmatpush.bf16.msra.mxu3 %v2702_v44  ;;  %v3407_v2 = vld [vmem:[%s5358_s1 + $0x124] sm:$0xf] }
  0x24   :  { %v3565_v38 = vld [vmem:[%s5358_s1 + $0x60c] sm:$0xf0]  ;;  %v25_v42 = vld [vmem:[%s5357_s0] sm:$0xff]  ;;  %v3955_v54 = vpack.c.bf16 %v34_v36, %v27_v34  ;;  %1292 = vmatpush.bf16.msrb.mxu0 %v2942_v45  ;;  %v2367_v35 = vld [vmem:[%s5358_s1 + $0x70] sm:$0xf0] }
  0x25   :  { %v35_v48 = vld [vmem:[%s5357_s0 + $0x50] sm:$0xff]  ;;  %v2925_v51 = vld [vmem:[%s5358_s1 + $0x4c0] sm:$0xf]  ;;  %v3957_v55 = vpack.c.bf16 %v32_v43, %v25_v42  ;;  %v3086_v59 = vor.u32 %v3565_v38, %v3085_v37  ;;  %1306 = vmatpush.bf16.msrb.mxu1 %v3070_v49  ;;  %v3383_v34 = vld [vmem:[%s5358_s1 + $0x64] sm:$0xf]  ;;  %v2514_v37 = vor.u32 %v3419_v26, %v2511_v27 }
  0x26   :  { %v3525_v52 = vld [vmem:[%s5358_s1 + $0x4cc] sm:$0xf0]  ;;  %v3053_v53 = vld [vmem:[%s5358_s1 + $0x5c0] sm:$0xf]  ;;  %v3968_v60 = vpack.c.bf16 %v35_v48, %v28_v47  ;;  %1272 = vmatmul.bf16.vlgmr.msra.gmra.mxu2 %v3955_v54  ;;  %v3415_v36 = vld [vmem:[%s5358_s1 + $0x164] sm:$0xf]  ;;  %v2370_v43 = vor.u32 %v3383_v34, %v2367_v35 }
  0x27   :  { %v3557_v56 = vld [vmem:[%s5358_s1 + $0x5cc] sm:$0xf0]  ;;  %v33_v62 = vld [vmem:[%s5357_s0 + $0x40] sm:$0xff]  ;;  %v2926_v0 = vor.u32 %v3525_v52, %v2925_v51  ;;  %1334 = vmatpush.bf16.msrb.mxu3 %v2434_v50  ;;  %1244 = vmatmul.bf16.vlgmr.msra.gmra.mxu0 %v3957_v55  ;;  %v2495_v39 = vld [vmem:[%s5358_s1 + $0x170] sm:$0xf0] }
  0x28   :  { %v3054_v3 = vor.u32 %v3557_v56, %v3053_v53  ;;  %v2909_v5 = vld [vmem:[%s5358_s1 + $0x4a0] sm:$0xf]  ;;  %v3521_v6 = vld [vmem:[%s5358_s1 + $0x4ac] sm:$0xf0]  ;;  %v3993_v8 = vpack.c.bf16 %v33_v62, %v26_v61  ;;  %1327 = vmatpush.bf16.msrb.mxu2 %v3086_v59  ;;  %1286 = vmatmul.bf16.vlgmr.msra.gmra.mxu3 %v3968_v60  ;;  %v3379_v48 = vld [vmem:[%s5358_s1 + $0x44] sm:$0xf]  ;;  %v2498_v51 = vor.u32 %v3415_v36, %v2495_v39 }
  0x29   :  { %v3037_v7 = vld [vmem:[%s5358_s1 + $0x5a0] sm:$0xf]  ;;  %v3553_v9 = vld [vmem:[%s5358_s1 + $0x5ac] sm:$0xf0]  ;;  %1293 = vmatpush.bf16.msrb.mxu0 %v2926_v0  ;;  %v2910_v13 = vor.u32 %v3521_v6, %v2909_v5  ;;  %v2351_v49 = vld [vmem:[%s5358_s1 + $0x50] sm:$0xf0] }
  0x2a   :  { %1307 = vmatpush.bf16.msrb.mxu1 %v3054_v3  ;;  %v3038_v16 = vor.u32 %v3553_v9, %v3037_v7  ;;  %v2893_v18 = vld [vmem:[%s5358_s1 + $0x480] sm:$0xf]  ;;  %v3517_v19 = vld [vmem:[%s5358_s1 + $0x48c] sm:$0xf0]  ;;  %v3411_v53 = vld [vmem:[%s5358_s1 + $0x144] sm:$0xf]  ;;  %v2354_v58 = vor.u32 %v3379_v48, %v2351_v49 }
  0x2b   :  { %1335 = vmatpush.bf16.msrb.mxu3 %v2418_v4  ;;  %v3021_v20 = vld [vmem:[%s5358_s1 + $0x580] sm:$0xf]  ;;  %1258 = vmatmul.bf16.vlgmr.msra.gmra.mxu1 %v3993_v8  ;;  %v3549_v21 = vld [vmem:[%s5358_s1 + $0x58c] sm:$0xf0]  ;;  %v2894_v25 = vor.u32 %v3517_v19, %v2893_v18  ;;  %v2479_v56 = vld [vmem:[%s5358_s1 + $0x150] sm:$0xf0] }
  0x2c   :  { %1348 = vmatpush.bf16.msra.mxu2 %v2562_v63  ;;  %v3022_v28 = vor.u32 %v3549_v21, %v3021_v20  ;;  %v2877_v30 = vld [vmem:[%s5358_s1 + $0x460] sm:$0xf]  ;;  %v3513_v31 = vld [vmem:[%s5358_s1 + $0x46c] sm:$0xf0]  ;;  %v3375_v0 = vld [vmem:[%s5358_s1 + $0x24] sm:$0xf]  ;;  %v2482_v4 = vor.u32 %v3411_v53, %v2479_v56 }
  0x2d   :  { %1294 = vmatpush.bf16.msrb.mxu0 %v2910_v13  ;;  %v3005_v32 = vld [vmem:[%s5358_s1 + $0x560] sm:$0xf]  ;;  %v3545_v33 = vld [vmem:[%s5358_s1 + $0x56c] sm:$0xf0]  ;;  %v2878_v38 = vor.u32 %v3513_v31, %v2877_v30  ;;  %v2335_v1 = vld [vmem:[%s5358_s1 + $0x30] sm:$0xf0] }
  0x2e   :  { %1308 = vmatpush.bf16.msrb.mxu1 %v3038_v16  ;;  %v31_v40 = vld [vmem:[%s5357_s0 + $0x30] sm:$0xff]  ;;  %v3006_v42 = vor.u32 %v3545_v33, %v3005_v32  ;;  %v2861_v44 = vld [vmem:[%s5358_s1 + $0x440] sm:$0xf]  ;;  %v2338_v11 = vor.u32 %v3375_v0, %v2335_v1  ;;  %v3371_v13 = vld [vmem:[%s5358_s1 + $0x4] sm:$0xf] }
  0x2f   :  { %1336 = vmatpush.bf16.msrb.mxu3 %v2402_v17  ;;  %v3509_v45 = vld [vmem:[%s5358_s1 + $0x44c] sm:$0xf0]  ;;  %v2989_v46 = vld [vmem:[%s5358_s1 + $0x540] sm:$0xf]  ;;  %v4084_v50 = vpack.c.bf16 %v38_v41, %v31_v40  ;;  %v2463_v3 = vld [vmem:[%s5358_s1 + $0x130] sm:$0xf0] }
  0x30   :  { %1349 = vmatpush.bf16.msra.mxu2 %v2546_v12  ;;  %v3541_v47 = vld [vmem:[%s5358_s1 + $0x54c] sm:$0xf0]  ;;  %v2862_v52 = vor.u32 %v3509_v45, %v2861_v44  ;;  %v2845_v59 = vld [vmem:[%s5358_s1 + $0x420] sm:$0xf]  ;;  %v2319_v14 = vld [vmem:[%s5358_s1 + $0x10] sm:$0xf0]  ;;  %v2466_v21 = vor.u32 %v3407_v2, %v2463_v3 }
  0x31   :  { %1295 = vmatpush.bf16.msrb.mxu0 %v2894_v25  ;;  %v2990_v57 = vor.u32 %v3541_v47, %v2989_v46  ;;  %v3505_v61 = vld [vmem:[%s5358_s1 + $0x42c] sm:$0xf0]  ;;  %v2973_v62 = vld [vmem:[%s5358_s1 + $0x520] sm:$0xf]  ;;  %v3463_v15 = vld [vmem:[%s5358_s1 + $0x2e4] sm:$0xf]  ;;  %v2322_v27 = vor.u32 %v3371_v13, %v2319_v14 }
  0x32   :  { %1309 = vmatpush.bf16.msrb.mxu1 %v3022_v28  ;;  %v3537_v63 = vld [vmem:[%s5358_s1 + $0x52c] sm:$0xf0]  ;;  %v2846_v5 = vor.u32 %v3505_v61, %v2845_v59  ;;  %v2829_v6 = vld [vmem:[%s5358_s1 + $0x400] sm:$0xf]  ;;  %v2687_v16 = vld [vmem:[%s5358_s1 + $0x2f0] sm:$0xf0] }
  0x33   :  { %1337 = vmatpush.bf16.msrb.mxu3 %v2386_v29  ;;  %v3501_v7 = vld [vmem:[%s5358_s1 + $0x40c] sm:$0xf0]  ;;  %v2957_v9 = vld [vmem:[%s5358_s1 + $0x500] sm:$0xf]  ;;  %v2974_v10 = vor.u32 %v3537_v63, %v2973_v62  ;;  %v3495_v17 = vld [vmem:[%s5358_s1 + $0x3e4] sm:$0xf]  ;;  %v2690_v31 = vor.u32 %v3463_v15, %v2687_v16 }
  0x34   :  { %1350 = vmatpush.bf16.msra.mxu2 %v2530_v24  ;;  %v3533_v12 = vld [vmem:[%s5358_s1 + $0x50c] sm:$0xf0]  ;;  %v2815_v18 = vld [vmem:[%s5358_s1 + $0x3f0] sm:$0xf0]  ;;  %v3527_v19 = vld [vmem:[%s5358_s1 + $0x4e4] sm:$0xf]  ;;  %v2830_v22 = vor.u32 %v3501_v7, %v2829_v6 }
  0x35   :  { %1296 = vmatpush.bf16.msrb.mxu0 %v2878_v38  ;;  %v2943_v20 = vld [vmem:[%s5358_s1 + $0x4f0] sm:$0xf0]  ;;  %v29_v23 = vld [vmem:[%s5357_s0 + $0x20] sm:$0xff]  ;;  %v36_v24 = vld [vmem:[%s5357_s0 + $0x58] sm:$0xff]  ;;  %v2958_v26 = vor.u32 %v3533_v12, %v2957_v9  ;;  %v2818_v32 = vor.u32 %v3495_v17, %v2815_v18 }
  0x36   :  { %1310 = vmatpush.bf16.msrb.mxu1 %v3006_v42  ;;  %3099 = vmatmul.msk.bf16.vlgmr.msrb.gmra.mxu2 %vm1232_vm0, %v4084_v50  ;;  %v3403_v25 = vld [vmem:[%s5358_s1 + $0x104] sm:$0xf]  ;;  %v2447_v28 = vld [vmem:[%s5358_s1 + $0x110] sm:$0xf0]  ;;  %v30_v29 = vld [vmem:[%s5357_s0 + $0x28] sm:$0xff]  ;;  %v2946_v36 = vor.u32 %v3527_v19, %v2943_v20 }
  0x37   :  { %1338 = vmatpush.bf16.msrb.mxu3 %v2370_v43  ;;  %v37_v30 = vld [vmem:[%s5357_s0 + $0x60] sm:$0xff]  ;;  %v3071_v34 = vld [vmem:[%s5358_s1 + $0x5f0] sm:$0xf0]  ;;  %v2450_v41 = vor.u32 %v3403_v25, %v2447_v28 }
  0x38   :  { %1351 = vmatpush.bf16.msra.mxu2 %v2514_v37  ;;  %v3559_v33 = vld [vmem:[%s5358_s1 + $0x5e4] sm:$0xf]  ;;  %v4181_v37 = vpack.c.bf16 %v36_v24, %v29_v23  ;;  %v2671_v38 = vld [vmem:[%s5358_s1 + $0x2d0] sm:$0xf0]  ;;  %v4192_v42 = vpack.c.bf16 %v37_v30, %v30_v29 }
  0x39   :  { %1297 = vmatpush.bf16.msrb.mxu0 %v2862_v52  ;;  %v3459_v35 = vld [vmem:[%s5358_s1 + $0x2c4] sm:$0xf]  ;;  %v2799_v40 = vld [vmem:[%s5358_s1 + $0x3d0] sm:$0xf0]  ;;  %v3074_v45 = vor.u32 %v3559_v33, %v3071_v34 }
  0x3a   :  { %1311 = vmatpush.bf16.msrb.mxu1 %v2990_v57  ;;  %v3491_v39 = vld [vmem:[%s5358_s1 + $0x3c4] sm:$0xf]  ;;  %v2927_v44 = vld [vmem:[%s5358_s1 + $0x4d0] sm:$0xf0]  ;;  %v2674_v46 = vor.u32 %v3459_v35, %v2671_v38 }
  0x3b   :  { %1339 = vmatpush.bf16.msrb.mxu3 %v2354_v58  ;;  %v3523_v43 = vld [vmem:[%s5358_s1 + $0x4c4] sm:$0xf]  ;;  %v2802_v47 = vor.u32 %v3491_v39, %v2799_v40  ;;  %v3055_v49 = vld [vmem:[%s5358_s1 + $0x5d0] sm:$0xf0] }
  0x3c   :  { %1352 = vmatpush.bf16.msra.mxu2 %v2498_v51  ;;  %v3555_v48 = vld [vmem:[%s5358_s1 + $0x5c4] sm:$0xf]  ;;  %v2930_v52 = vor.u32 %v3523_v43, %v2927_v44  ;;  %v2655_v53 = vld [vmem:[%s5358_s1 + $0x2b0] sm:$0xf0] }
  0x3d   :  { %1298 = vmatpush.bf16.msrb.mxu0 %v2846_v5  ;;  %v3455_v51 = vld [vmem:[%s5358_s1 + $0x2a4] sm:$0xf]  ;;  %v2783_v57 = vld [vmem:[%s5358_s1 + $0x3b0] sm:$0xf0]  ;;  %v3058_v61 = vor.u32 %v3555_v48, %v3055_v49 }
  0x3e   :  { %1312 = vmatpush.bf16.msrb.mxu1 %v2974_v10  ;;  %v3487_v56 = vld [vmem:[%s5358_s1 + $0x3a4] sm:$0xf]  ;;  %v2911_v59 = vld [vmem:[%s5358_s1 + $0x4b0] sm:$0xf0]  ;;  %v2658_v62 = vor.u32 %v3455_v51, %v2655_v53 }
  0x3f   :  { %1340 = vmatpush.bf16.msrb.mxu3 %v2338_v11  ;;  %v3519_v58 = vld [vmem:[%s5358_s1 + $0x4a4] sm:$0xf]  ;;  %v2786_v63 = vor.u32 %v3487_v56, %v2783_v57  ;;  %v3039_v1 = vld [vmem:[%s5358_s1 + $0x5b0] sm:$0xf0] }
  0x40   :  { %1353 = vmatpush.bf16.msra.mxu2 %v2482_v4  ;;  %v3551_v0 = vld [vmem:[%s5358_s1 + $0x5a4] sm:$0xf]  ;;  %v2914_v3 = vor.u32 %v3519_v58, %v2911_v59  ;;  %v2639_v4 = vld [vmem:[%s5358_s1 + $0x290] sm:$0xf0] }
  0x41   :  { %1299 = vmatpush.bf16.msrb.mxu0 %v2830_v22  ;;  %v3451_v2 = vld [vmem:[%s5358_s1 + $0x284] sm:$0xf]  ;;  %v2767_v6 = vld [vmem:[%s5358_s1 + $0x390] sm:$0xf0]  ;;  %v3042_v10 = vor.u32 %v3551_v0, %v3039_v1  ;;  %v2565_v0 = vld [vmem:[%s5358_s1 + $0x1e8] sm:$0xf] }
  0x42   :  { %1313 = vmatpush.bf16.msrb.mxu1 %v2958_v26  ;;  %v3483_v5 = vld [vmem:[%s5358_s1 + $0x384] sm:$0xf]  ;;  %v2895_v9 = vld [vmem:[%s5358_s1 + $0x490] sm:$0xf0]  ;;  %v2642_v11 = vor.u32 %v3451_v2, %v2639_v4  ;;  %v3434_v4 = vld [vmem:[%s5358_s1 + $0x1f4] sm:$0xf0] }
  0x43   :  { %1341 = vmatpush.bf16.msrb.mxu3 %v2322_v27  ;;  %v3515_v7 = vld [vmem:[%s5358_s1 + $0x484] sm:$0xf]  ;;  %v2770_v12 = vor.u32 %v3483_v5, %v2767_v6  ;;  %v3023_v14 = vld [vmem:[%s5358_s1 + $0x590] sm:$0xf0]  ;;  %v2693_v5 = vld [vmem:[%s5358_s1 + $0x2e8] sm:$0xf] }
  0x44   :  { %1354 = vmatpush.bf16.msra.mxu2 %v2466_v21  ;;  %1300 = vmatmul.bf16.vlgmr.msrb.gmra.mxu0 %v4181_v37  ;;  %v3547_v13 = vld [vmem:[%s5358_s1 + $0x584] sm:$0xf]  ;;  %v2898_v16 = vor.u32 %v3515_v7, %v2895_v9  ;;  %v2623_v17 = vld [vmem:[%s5358_s1 + $0x270] sm:$0xf0]  ;;  %v3466_v6 = vld [vmem:[%s5358_s1 + $0x2f4] sm:$0xf0] }
  0x45   :  { %1362 = vmatpush.bf16.msra.mxu0 %v2690_v31  ;;  %1314 = vmatmul.bf16.vlgmr.msrb.gmra.mxu1 %v4192_v42  ;;  %v3447_v15 = vld [vmem:[%s5358_s1 + $0x264] sm:$0xf]  ;;  %v2751_v19 = vld [vmem:[%s5358_s1 + $0x370] sm:$0xf0]  ;;  %v3026_v22 = vor.u32 %v3547_v13, %v3023_v14  ;;  %v2437_v14 = vld [vmem:[%s5358_s1 + $0xe8] sm:$0xf] }
  0x46   :  { %1376 = vmatpush.bf16.msra.mxu1 %v2818_v32  ;;  %1342 = vmatmul.bf16.vlgmr.msrb.gmra.mxu3 %v3957_v55  ;;  %v3479_v18 = vld [vmem:[%s5358_s1 + $0x364] sm:$0xf]  ;;  %v2879_v21 = vld [vmem:[%s5358_s1 + $0x470] sm:$0xf0]  ;;  %v2626_v23 = vor.u32 %v3447_v15, %v2623_v17  ;;  %v3402_v15 = vld [vmem:[%s5358_s1 + $0xf4] sm:$0xf0] }
  0x47   :  { %1390 = vmatpush.bf16.msra.mxu3 %v2946_v36  ;;  %v3511_v20 = vld [vmem:[%s5358_s1 + $0x464] sm:$0xf]  ;;  %v2754_v24 = vor.u32 %v3479_v18, %v2751_v19  ;;  %v3007_v26 = vld [vmem:[%s5358_s1 + $0x570] sm:$0xf0]  ;;  %v2821_v17 = vld [vmem:[%s5358_s1 + $0x3e8] sm:$0xf] }
  0x48   :  { %1355 = vmatpush.bf16.msra.mxu2 %v2450_v41  ;;  %v3543_v25 = vld [vmem:[%s5358_s1 + $0x564] sm:$0xf]  ;;  %v2882_v28 = vor.u32 %v3511_v20, %v2879_v21  ;;  %v2607_v29 = vld [vmem:[%s5358_s1 + $0x250] sm:$0xf0]  ;;  %v3498_v18 = vld [vmem:[%s5358_s1 + $0x3f4] sm:$0xf0]  ;;  %v2694_v20 = vor.u32 %v3466_v6, %v2693_v5 }
  0x49   :  { %1363 = vmatpush.bf16.msra.mxu0 %v2674_v46  ;;  %v3443_v27 = vld [vmem:[%s5358_s1 + $0x244] sm:$0xf]  ;;  %v2735_v31 = vld [vmem:[%s5358_s1 + $0x350] sm:$0xf0]  ;;  %v3010_v34 = vor.u32 %v3543_v25, %v3007_v26  ;;  %v2549_v19 = vld [vmem:[%s5358_s1 + $0x1c8] sm:$0xf] }
  0x4a   :  { %1377 = vmatpush.bf16.msra.mxu1 %v2802_v47  ;;  %v3475_v30 = vld [vmem:[%s5358_s1 + $0x344] sm:$0xf]  ;;  %v2863_v33 = vld [vmem:[%s5358_s1 + $0x450] sm:$0xf0]  ;;  %v2610_v35 = vor.u32 %v3443_v27, %v2607_v29  ;;  %v3430_v21 = vld [vmem:[%s5358_s1 + $0x1d4] sm:$0xf0]  ;;  %v2438_v27 = vor.u32 %v3402_v15, %v2437_v14 }
  0x4b   :  { %1391 = vmatpush.bf16.msra.mxu3 %v2930_v52  ;;  %1356 = vmatmul.bf16.vlgmr.msra.gmra.mxu2 %v3993_v8  ;;  %v3507_v32 = vld [vmem:[%s5358_s1 + $0x444] sm:$0xf]  ;;  %v2738_v36 = vor.u32 %v3475_v30, %v2735_v31  ;;  %v2991_v39 = vld [vmem:[%s5358_s1 + $0x550] sm:$0xf0]  ;;  %v2421_v25 = vld [vmem:[%s5358_s1 + $0xc8] sm:$0xf] }
  0x4c   :  { %1404 = vmatpush.bf16.msrb.mxu2 %v3074_v45  ;;  %v3539_v38 = vld [vmem:[%s5358_s1 + $0x544] sm:$0xf]  ;;  %v2866_v41 = vor.u32 %v3507_v32, %v2863_v33  ;;  %v2591_v43 = vld [vmem:[%s5358_s1 + $0x230] sm:$0xf0]  ;;  %v3398_v26 = vld [vmem:[%s5358_s1 + $0xd4] sm:$0xf0]  ;;  %v2550_v32 = vor.u32 %v3430_v21, %v2549_v19 }
  0x4d   :  { %1364 = vmatpush.bf16.msra.mxu0 %v2658_v62  ;;  %v3439_v40 = vld [vmem:[%s5358_s1 + $0x224] sm:$0xf]  ;;  %v2719_v45 = vld [vmem:[%s5358_s1 + $0x330] sm:$0xf0]  ;;  %v2994_v48 = vor.u32 %v3539_v38, %v2991_v39  ;;  %v2805_v29 = vld [vmem:[%s5358_s1 + $0x3c8] sm:$0xf] }
  0x4e   :  { %1378 = vmatpush.bf16.msra.mxu1 %v2786_v63  ;;  %v3471_v44 = vld [vmem:[%s5358_s1 + $0x324] sm:$0xf]  ;;  %v2847_v47 = vld [vmem:[%s5358_s1 + $0x430] sm:$0xf0]  ;;  %v2594_v52 = vor.u32 %v3439_v40, %v2591_v43  ;;  %v3494_v30 = vld [vmem:[%s5358_s1 + $0x3d4] sm:$0xf0] }
  0x4f   :  { %1392 = vmatpush.bf16.msra.mxu3 %v2914_v3  ;;  %v3503_v46 = vld [vmem:[%s5358_s1 + $0x424] sm:$0xf]  ;;  %v2975_v51 = vld [vmem:[%s5358_s1 + $0x530] sm:$0xf0]  ;;  %v2722_v53 = vor.u32 %v3471_v44, %v2719_v45  ;;  %v2533_v31 = vld [vmem:[%s5358_s1 + $0x1a8] sm:$0xf] }
  0x50   :  { %1405 = vmatpush.bf16.msrb.mxu2 %v3058_v61  ;;  %v3535_v49 = vld [vmem:[%s5358_s1 + $0x524] sm:$0xf]  ;;  %v2575_v57 = vld [vmem:[%s5358_s1 + $0x210] sm:$0xf0]  ;;  %v2850_v59 = vor.u32 %v3503_v46, %v2847_v47  ;;  %v3426_v33 = vld [vmem:[%s5358_s1 + $0x1b4] sm:$0xf0] }
  0x51   :  { %1365 = vmatpush.bf16.msra.mxu0 %v2642_v11  ;;  %v3435_v56 = vld [vmem:[%s5358_s1 + $0x204] sm:$0xf]  ;;  %v2703_v61 = vld [vmem:[%s5358_s1 + $0x310] sm:$0xf0]  ;;  %v2978_v3 = vor.u32 %v3535_v49, %v2975_v51 }
  0x52   :  { %1379 = vmatpush.bf16.msra.mxu1 %v2770_v12  ;;  %v3467_v58 = vld [vmem:[%s5358_s1 + $0x304] sm:$0xf]  ;;  %v2831_v63 = vld [vmem:[%s5358_s1 + $0x410] sm:$0xf0]  ;;  %v2578_v7 = vor.u32 %v3435_v56, %v2575_v57 }
  0x53   :  { %1393 = vmatpush.bf16.msra.mxu3 %v2898_v16  ;;  %v3499_v62 = vld [vmem:[%s5358_s1 + $0x404] sm:$0xf]  ;;  %v3087_v2 = vld [vmem:[%s5358_s1 + $0x610] sm:$0xf0]  ;;  %v2706_v9 = vor.u32 %v3467_v58, %v2703_v61  ;;  %v2566_v16 = vor.u32 %v3434_v4, %v2565_v0 }
  0x54   :  { %1406 = vmatpush.bf16.msrb.mxu2 %v3042_v10  ;;  %v3563_v1 = vld [vmem:[%s5358_s1 + $0x604] sm:$0xf]  ;;  %v2834_v11 = vor.u32 %v3499_v62, %v2831_v63  ;;  %v2959_v12 = vld [vmem:[%s5358_s1 + $0x510] sm:$0xf0] }
  0x55   :  { %1366 = vmatpush.bf16.msra.mxu0 %v2626_v23  ;;  %v3531_v10 = vld [vmem:[%s5358_s1 + $0x504] sm:$0xf]  ;;  %v3090_v13 = vor.u32 %v3563_v1, %v3087_v2  ;;  %v3462_v23 = vld [vmem:[%s5358_s1 + $0x2d4] sm:$0xf0] }
  0x56   :  { %1380 = vmatpush.bf16.msra.mxu1 %v2754_v24  ;;  %v2962_v24 = vor.u32 %v3531_v10, %v2959_v12 }
  0x57   :  { %1394 = vmatpush.bf16.msra.mxu3 %v2882_v28  ;;  %v2822_v28 = vor.u32 %v3498_v18, %v2821_v17 }
  0x58   :  { %1407 = vmatpush.bf16.msrb.mxu2 %v3026_v22  ;;  %v2677_v22 = vld [vmem:[%s5358_s1 + $0x2c8] sm:$0xf] }
  0x59   :  { %1367 = vmatpush.bf16.msra.mxu0 %v2610_v35  ;;  %v2661_v35 = vld [vmem:[%s5358_s1 + $0x2a8] sm:$0xf] }
  0x5a   :  { %1381 = vmatpush.bf16.msra.mxu1 %v2738_v36  ;;  %v3458_v36 = vld [vmem:[%s5358_s1 + $0x2b4] sm:$0xf0] }
  0x5b   :  { %1395 = vmatpush.bf16.msra.mxu3 %v2866_v41 }
  0x5c   :  { %1408 = vmatpush.bf16.msrb.mxu2 %v3010_v34  ;;  %v2678_v34 = vor.u32 %v3462_v23, %v2677_v22 }
  0x5d   :  { %1368 = vmatpush.bf16.msra.mxu0 %v2594_v52 }
  0x5e   :  { %1382 = vmatpush.bf16.msra.mxu1 %v2722_v53 }
  0x5f   :  { %1396 = vmatpush.bf16.msra.mxu3 %v2850_v59 }
  0x60   :  { %1409 = vmatpush.bf16.msrb.mxu2 %v2994_v48 }
  0x61   :  { %1369 = vmatpush.bf16.msra.mxu0 %v2578_v7 }
  0x62   :  { %1383 = vmatpush.bf16.msra.mxu1 %v2706_v9 }
  0x63   :  { %1397 = vmatpush.bf16.msra.mxu3 %v2834_v11 }
  0x64   :  { %1410 = vmatpush.bf16.msrb.mxu2 %v2978_v3  ;;  %1370 = vmatmul.bf16.vlgmr.msra.gmra.mxu0 %v3955_v54 }
  0x65   :  { %1460 = vmatpush.bf16.msrb.mxu0 %v2694_v20  ;;  %1384 = vmatmul.bf16.vlgmr.msra.gmra.mxu1 %v3968_v60 }
  0x66   :  { %1425 = vmatpush.bf16.msrb.mxu1 %v3090_v13 }
  0x67   :  { %1446 = vmatpush.bf16.msrb.mxu3 %v2566_v16 }
  0x68   :  { %11 = vsyncpa [#allocation3], 0  ;;  %1398 = vmatmul.bf16.vlgmr.msra.gmra.mxu3 %v4181_v37  ;;  %1411 = vmatpush.bf16.msrb.mxu2 %v2962_v24  ;;  %v2422_v38 = vor.u32 %v3398_v26, %v2421_v25  ;;  %v2806_v39 = vor.u32 %v3494_v30, %v2805_v29  ;;  %v2405_v40 = vld [vmem:[%s5358_s1 + $0xa8] sm:$0xf]  ;;  %v3394_v41 = vld [vmem:[%s5358_s1 + $0xb4] sm:$0xf0]  ;;  %v2534_v43 = vor.u32 %v3426_v33, %v2533_v31 }
  0x69   :  { %1461 = vmatpush.bf16.msrb.mxu0 %v2678_v34  ;;  %v2789_v44 = vld [vmem:[%s5358_s1 + $0x3a8] sm:$0xf]  ;;  %v3490_v45 = vld [vmem:[%s5358_s1 + $0x3b4] sm:$0xf0]  ;;  %v2662_v47 = vor.u32 %v3458_v36, %v2661_v35  ;;  %v2406_v52 = vor.u32 %v3394_v41, %v2405_v40  ;;  %vm1944_vm1 = vcmask 1042432   ;;  %vm1940_vm2 = vcmask 48128  }
  0x6a   :  { %1432 = vmatpush.bf16.msra.mxu1 %v2438_v27  ;;  %v2517_v46 = vld [vmem:[%s5358_s1 + $0x188] sm:$0xf]  ;;  %v3422_v48 = vld [vmem:[%s5358_s1 + $0x194] sm:$0xf0]  ;;  %v2790_v53 = vor.u32 %v3490_v45, %v2789_v44  ;;  %vm2177_vm3 = vcmask 1040384   ;;  %vm2178_vm4 = vcmask 1041408  }
  0x6b   :  { %1447 = vmatpush.bf16.msrb.mxu3 %v2550_v32  ;;  %1412 = vmatmul.bf16.vlgmr.msrb.gmra.mxu2 %v4192_v42  ;;  %v2645_v49 = vld [vmem:[%s5358_s1 + $0x288] sm:$0xf]  ;;  %v3454_v51 = vld [vmem:[%s5358_s1 + $0x294] sm:$0xf0]  ;;  %v2518_v58 = vor.u32 %v3422_v48, %v2517_v46  ;;  %vm2173_vm5 = vcmask 547840   ;;  %vm2271_vm6 = vcmask 793600  }
  0x6c   :  { %1474 = vmatpush.bf16.msra.mxu2 %v2822_v28  ;;  %v2389_v56 = vld [vmem:[%s5358_s1 + $0x88] sm:$0xf]  ;;  %v3390_v57 = vld [vmem:[%s5358_s1 + $0x94] sm:$0xf0]  ;;  %v2646_v63 = vor.u32 %v3454_v51, %v2645_v49  ;;  %vm2294_vm7 = vcmask 80896   ;;  %s3668_s24 = smov [#allocation2]  }
  0x6d   :  { %1462 = vmatpush.bf16.msrb.mxu0 %v2662_v47  ;;  %v2773_v59 = vld [vmem:[%s5358_s1 + $0x388] sm:$0xf]  ;;  %v3486_v61 = vld [vmem:[%s5358_s1 + $0x394] sm:$0xf0]  ;;  %v2390_v3 = vor.u32 %v3390_v57, %v2389_v56  ;;  %s2301_s25 = sshll.u32 %s3668_s24, 4  ;;  %s2303_s28 = sshll.u32 %s5363_s6, 4  ;;  %s2302_s25 = int_to_ptr.vmem [resolvable:$true] %s2301_s25  ;;  %s2304_s28 = int_to_ptr.hbm [resolvable:$true] %s2303_s28 }
  0x6e   :  { %1433 = vmatpush.bf16.msra.mxu1 %v2422_v38  ;;  %v2501_v62 = vld [vmem:[%s5358_s1 + $0x168] sm:$0xf]  ;;  %v3418_v0 = vld [vmem:[%s5358_s1 + $0x174] sm:$0xf0]  ;;  %v2774_v4 = vor.u32 %v3486_v61, %v2773_v59  ;;  %v3400_v61 = vld [vmem:[%s5358_s1 + $0xec] sm:$0xf] }
  0x6f   :  { %1448 = vmatpush.bf16.msrb.mxu3 %v2534_v43  ;;  %v2629_v1 = vld [vmem:[%s5358_s1 + $0x268] sm:$0xf]  ;;  %v3450_v2 = vld [vmem:[%s5358_s1 + $0x274] sm:$0xf0]  ;;  %v2502_v7 = vor.u32 %v3418_v0, %v2501_v62  ;;  %s3669_s29 = smov 128   ;;  %s3670_s30 = smov 8  }
  0x70   :  { %1475 = vmatpush.bf16.msra.mxu2 %v2806_v39  ;;  %v2373_v5 = vld [vmem:[%s5358_s1 + $0x68] sm:$0xf]  ;;  %v3386_v6 = vld [vmem:[%s5358_s1 + $0x74] sm:$0xf0]  ;;  %v2630_v12 = vor.u32 %v3450_v2, %v2629_v1 }
  0x71   :  { %1463 = vmatpush.bf16.msrb.mxu0 %v2646_v63  ;;  %v2757_v9 = vld [vmem:[%s5358_s1 + $0x368] sm:$0xf]  ;;  %v3482_v10 = vld [vmem:[%s5358_s1 + $0x374] sm:$0xf0]  ;;  %v2374_v16 = vor.u32 %v3386_v6, %v2373_v5  ;;  %v2439_v63 = vld [vmem:[%s5358_s1 + $0xf8] sm:$0xf0] }
  0x72   :  { %1434 = vmatpush.bf16.msra.mxu1 %v2406_v52  ;;  %v2485_v11 = vld [vmem:[%s5358_s1 + $0x148] sm:$0xf]  ;;  %v3414_v13 = vld [vmem:[%s5358_s1 + $0x154] sm:$0xf0]  ;;  %v2758_v17 = vor.u32 %v3482_v10, %v2757_v9  ;;  %v3432_v5 = vld [vmem:[%s5358_s1 + $0x1ec] sm:$0xf] }
  0x73   :  { %1449 = vmatpush.bf16.msrb.mxu3 %v2518_v58  ;;  %v2613_v14 = vld [vmem:[%s5358_s1 + $0x248] sm:$0xf]  ;;  %v3446_v15 = vld [vmem:[%s5358_s1 + $0x254] sm:$0xf0]  ;;  %v2486_v20 = vor.u32 %v3414_v13, %v2485_v11  ;;  %v2567_v6 = vld [vmem:[%s5358_s1 + $0x1f8] sm:$0xf0] }
  0x74   :  { %1476 = vmatpush.bf16.msra.mxu2 %v2790_v53  ;;  %v2357_v18 = vld [vmem:[%s5358_s1 + $0x48] sm:$0xf]  ;;  %v3382_v19 = vld [vmem:[%s5358_s1 + $0x54] sm:$0xf0]  ;;  %v2614_v24 = vor.u32 %v3446_v15, %v2613_v14  ;;  %v2423_v13 = vld [vmem:[%s5358_s1 + $0xd8] sm:$0xf0] }
  0x75   :  { %1464 = vmatpush.bf16.msrb.mxu0 %v2630_v12  ;;  %v2741_v21 = vld [vmem:[%s5358_s1 + $0x348] sm:$0xf]  ;;  %v3478_v22 = vld [vmem:[%s5358_s1 + $0x354] sm:$0xf0]  ;;  %3100 = vmatmul.msk.bf16.vlgmr.msrb.gmra.mxu1 %vm1232_vm0, %v4084_v50  ;;  %v2358_v28 = vor.u32 %v3382_v19, %v2357_v18  ;;  %v3396_v12 = vld [vmem:[%s5358_s1 + $0xcc] sm:$0xf] }
  0x76   :  { %1435 = vmatpush.bf16.msra.mxu1 %v2390_v3  ;;  %v2469_v23 = vld [vmem:[%s5358_s1 + $0x128] sm:$0xf]  ;;  %v3410_v25 = vld [vmem:[%s5358_s1 + $0x134] sm:$0xf0]  ;;  %v2742_v29 = vor.u32 %v3478_v22, %v2741_v21  ;;  %v3428_v18 = vld [vmem:[%s5358_s1 + $0x1cc] sm:$0xf] }
  0x77   :  { %1450 = vmatpush.bf16.msrb.mxu3 %v2502_v7  ;;  %v2597_v26 = vld [vmem:[%s5358_s1 + $0x228] sm:$0xf]  ;;  %v3442_v27 = vld [vmem:[%s5358_s1 + $0x234] sm:$0xf0]  ;;  %v2470_v33 = vor.u32 %v3410_v25, %v2469_v23  ;;  %v2442_v7 = vor.u32 %v3400_v61, %v2439_v63  ;;  %v2551_v19 = vld [vmem:[%s5358_s1 + $0x1d8] sm:$0xf0] }
  0x78   :  { %1477 = vmatpush.bf16.msra.mxu2 %v2774_v4  ;;  %v2341_v30 = vld [vmem:[%s5358_s1 + $0x28] sm:$0xf]  ;;  %v3378_v31 = vld [vmem:[%s5358_s1 + $0x34] sm:$0xf0]  ;;  %v2598_v38 = vor.u32 %v3442_v27, %v2597_v26  ;;  %v2407_v25 = vld [vmem:[%s5358_s1 + $0xb8] sm:$0xf0] }
  0x79   :  { %v2725_v32 = vld [vmem:[%s5358_s1 + $0x328] sm:$0xf]  ;;  %1465 = vmatpush.bf16.msrb.mxu0 %v2614_v24  ;;  %v3474_v34 = vld [vmem:[%s5358_s1 + $0x334] sm:$0xf0]  ;;  %v2342_v46 = vor.u32 %v3378_v31, %v2341_v30  ;;  %v3392_v24 = vld [vmem:[%s5358_s1 + $0xac] sm:$0xf] }
  0x7a   :  { %1436 = vmatpush.bf16.msra.mxu1 %v2374_v16  ;;  %v2453_v35 = vld [vmem:[%s5358_s1 + $0x108] sm:$0xf]  ;;  %v3406_v36 = vld [vmem:[%s5358_s1 + $0x114] sm:$0xf0]  ;;  %v2726_v47 = vor.u32 %v3474_v34, %v2725_v32  ;;  %v2570_v16 = vor.u32 %v3432_v5, %v2567_v6  ;;  %v3424_v30 = vld [vmem:[%s5358_s1 + $0x1ac] sm:$0xf]  ;;  %v2410_v32 = vor.u32 %v3392_v24, %v2407_v25 }
  0x7b   :  { %1451 = vmatpush.bf16.msrb.mxu3 %v2486_v20  ;;  %v3077_v39 = vld [vmem:[%s5358_s1 + $0x5e8] sm:$0xf]  ;;  %v3438_v41 = vld [vmem:[%s5358_s1 + $0x214] sm:$0xf0]  ;;  %v2454_v49 = vor.u32 %v3406_v36, %v2453_v35  ;;  %v2426_v20 = vor.u32 %v3396_v12, %v2423_v13  ;;  %v2535_v31 = vld [vmem:[%s5358_s1 + $0x1b8] sm:$0xf0] }
  0x7c   :  { %1478 = vmatpush.bf16.msra.mxu2 %v2758_v17  ;;  %v2581_v40 = vld [vmem:[%s5358_s1 + $0x208] sm:$0xf]  ;;  %v3562_v43 = vld [vmem:[%s5358_s1 + $0x5f4] sm:$0xf0]  ;;  %v3388_v36 = vld [vmem:[%s5358_s1 + $0x8c] sm:$0xf] }
  0x7d   :  { %v3093_v44 = vld [vmem:[%s5358_s1 + $0x608] sm:$0xf]  ;;  %v3566_v45 = vld [vmem:[%s5358_s1 + $0x614] sm:$0xf0]  ;;  %1466 = vmatpush.bf16.msrb.mxu0 %v2598_v38  ;;  %v2582_v56 = vor.u32 %v3438_v41, %v2581_v40  ;;  %v3078_v57 = vor.u32 %v3562_v43, %v3077_v39  ;;  %v2391_v38 = vld [vmem:[%s5358_s1 + $0x98] sm:$0xf0]  ;;  %v2538_v41 = vor.u32 %v3424_v30, %v2535_v31 }
  0x7e   :  { %1437 = vmatpush.bf16.msra.mxu1 %v2358_v28  ;;  %v2325_v48 = vld [vmem:[%s5358_s1 + $0x8] sm:$0xf]  ;;  %v3374_v51 = vld [vmem:[%s5358_s1 + $0x14] sm:$0xf0]  ;;  %v3094_v62 = vor.u32 %v3566_v45, %v3093_v44  ;;  %v2554_v28 = vor.u32 %v3428_v18, %v2551_v19  ;;  %v3420_v44 = vld [vmem:[%s5358_s1 + $0x18c] sm:$0xf] }
  0x7f   :  { %1452 = vmatpush.bf16.msrb.mxu3 %v2470_v33  ;;  %v2709_v52 = vld [vmem:[%s5358_s1 + $0x308] sm:$0xf]  ;;  %v3470_v53 = vld [vmem:[%s5358_s1 + $0x314] sm:$0xf0]  ;;  %v2326_v2 = vor.u32 %v3374_v51, %v2325_v48  ;;  %v2519_v45 = vld [vmem:[%s5358_s1 + $0x198] sm:$0xf0] }
  0x80   :  { %1479 = vmatpush.bf16.msra.mxu2 %v2742_v29  ;;  %v2949_v58 = vld [vmem:[%s5358_s1 + $0x4e8] sm:$0xf]  ;;  %v3530_v59 = vld [vmem:[%s5358_s1 + $0x4f4] sm:$0xf0]  ;;  %v2710_v3 = vor.u32 %v3470_v53, %v2709_v52  ;;  %v3384_v51 = vld [vmem:[%s5358_s1 + $0x6c] sm:$0xf] }
  0x81   :  { %v3061_v0 = vld [vmem:[%s5358_s1 + $0x5c8] sm:$0xf]  ;;  %v3558_v1 = vld [vmem:[%s5358_s1 + $0x5d4] sm:$0xf0]  ;;  %v2950_v4 = vor.u32 %v3530_v59, %v2949_v58  ;;  %1467 = vmatpush.bf16.msrb.mxu0 %v2582_v56  ;;  %v2375_v52 = vld [vmem:[%s5358_s1 + $0x78] sm:$0xf0] }
  0x82   :  { %1438 = vmatpush.bf16.msra.mxu1 %v2342_v46  ;;  %v3062_v9 = vor.u32 %v3558_v1, %v3061_v0  ;;  %v2933_v10 = vld [vmem:[%s5358_s1 + $0x4c8] sm:$0xf]  ;;  %v3526_v11 = vld [vmem:[%s5358_s1 + $0x4d4] sm:$0xf0]  ;;  %v2394_v46 = vor.u32 %v3388_v36, %v2391_v38  ;;  %v3416_v59 = vld [vmem:[%s5358_s1 + $0x16c] sm:$0xf] }
  0x83   :  { %1453 = vmatpush.bf16.msrb.mxu3 %v2454_v49  ;;  %v3045_v14 = vld [vmem:[%s5358_s1 + $0x5a8] sm:$0xf]  ;;  %v3554_v15 = vld [vmem:[%s5358_s1 + $0x5b4] sm:$0xf0]  ;;  %v2934_v17 = vor.u32 %v3526_v11, %v2933_v10  ;;  %v2503_v61 = vld [vmem:[%s5358_s1 + $0x178] sm:$0xf0] }
  0x84   :  { %1480 = vmatpush.bf16.msra.mxu2 %v2726_v47  ;;  %v3046_v21 = vor.u32 %v3554_v15, %v3045_v14  ;;  %v2917_v22 = vld [vmem:[%s5358_s1 + $0x4a8] sm:$0xf]  ;;  %v3522_v23 = vld [vmem:[%s5358_s1 + $0x4b4] sm:$0xf0]  ;;  %1468 = vmatmul.bf16.vlgmr.msrb.gmra.mxu0 %v3955_v54  ;;  %v2506_v6 = vor.u32 %v3416_v59, %v2503_v61  ;;  %v2487_v10 = vld [vmem:[%s5358_s1 + $0x158] sm:$0xf0] }
  0x85   :  { %1523 = vmatpush.bf16.msra.mxu0 %v3094_v62  ;;  %v3029_v26 = vld [vmem:[%s5358_s1 + $0x588] sm:$0xf]  ;;  %v3550_v27 = vld [vmem:[%s5358_s1 + $0x594] sm:$0xf0]  ;;  %v2918_v29 = vor.u32 %v3522_v23, %v2917_v22  ;;  %v2378_v62 = vor.u32 %v3384_v51, %v2375_v52  ;;  %v3376_v15 = vld [vmem:[%s5358_s1 + $0x2c] sm:$0xf] }
  0x86   :  { %1439 = vmatpush.bf16.msra.mxu1 %v2326_v2  ;;  %1454 = vmatmul.bf16.vlgmr.msrb.gmra.mxu3 %v3993_v8  ;;  %v3030_v33 = vor.u32 %v3550_v27, %v3029_v26  ;;  %v2901_v34 = vld [vmem:[%s5358_s1 + $0x488] sm:$0xf]  ;;  %v3518_v35 = vld [vmem:[%s5358_s1 + $0x494] sm:$0xf0]  ;;  %v3380_v2 = vld [vmem:[%s5358_s1 + $0x4c] sm:$0xf] }
  0x87   :  { %1502 = vmatpush.bf16.msra.mxu3 %v3078_v57  ;;  %v3013_v39 = vld [vmem:[%s5358_s1 + $0x568] sm:$0xf]  ;;  %v3546_v40 = vld [vmem:[%s5358_s1 + $0x574] sm:$0xf0]  ;;  %v2902_v43 = vor.u32 %v3518_v35, %v2901_v34  ;;  %v2522_v57 = vor.u32 %v3420_v44, %v2519_v45  ;;  %v3408_v24 = vld [vmem:[%s5358_s1 + $0x12c] sm:$0xf] }
  0x88   :  { %1481 = vmatpush.bf16.msra.mxu2 %v2710_v3  ;;  %v3014_v47 = vor.u32 %v3546_v40, %v3013_v39  ;;  %v2885_v48 = vld [vmem:[%s5358_s1 + $0x468] sm:$0xf]  ;;  %v3514_v49 = vld [vmem:[%s5358_s1 + $0x474] sm:$0xf0]  ;;  %v2359_v3 = vld [vmem:[%s5358_s1 + $0x58] sm:$0xf0] }
  0x89   :  { %1440 = vmatmul.bf16.vlgmr.msra.gmra.mxu1 %v3957_v55  ;;  %1544 = vmatpush.bf16.msrb.mxu0 %v2570_v16  ;;  %v2997_v53 = vld [vmem:[%s5358_s1 + $0x548] sm:$0xf]  ;;  %v3542_v56 = vld [vmem:[%s5358_s1 + $0x554] sm:$0xf0]  ;;  %v2886_v58 = vor.u32 %v3514_v49, %v2885_v48  ;;  %v2362_v11 = vor.u32 %v3380_v2, %v2359_v3  ;;  %v2343_v16 = vld [vmem:[%s5358_s1 + $0x38] sm:$0xf0] }
  0x8a   :  { %1488 = vmatpush.bf16.msrb.mxu1 %v2950_v4  ;;  %v2998_v63 = vor.u32 %v3542_v56, %v2997_v53  ;;  %v2869_v0 = vld [vmem:[%s5358_s1 + $0x448] sm:$0xf]  ;;  %v3510_v1 = vld [vmem:[%s5358_s1 + $0x454] sm:$0xf0]  ;;  %v2471_v25 = vld [vmem:[%s5358_s1 + $0x138] sm:$0xf0]  ;;  %v2346_v26 = vor.u32 %v3376_v15, %v2343_v16 }
  0x8b   :  { %1503 = vmatpush.bf16.msra.mxu3 %v3062_v9  ;;  %1482 = vmatmul.bf16.vlgmr.msra.gmra.mxu2 %v3968_v60  ;;  %v2981_v4 = vld [vmem:[%s5358_s1 + $0x528] sm:$0xf]  ;;  %v3538_v5 = vld [vmem:[%s5358_s1 + $0x534] sm:$0xf0]  ;;  %v3412_v9 = vld [vmem:[%s5358_s1 + $0x14c] sm:$0xf]  ;;  %v2474_v36 = vor.u32 %v3408_v24, %v2471_v25 }
  0x8c   :  { %1530 = vmatpush.bf16.msrb.mxu2 %v2442_v7  ;;  %v2870_v7 = vor.u32 %v3510_v1, %v2869_v0  ;;  %v2982_v12 = vor.u32 %v3538_v5, %v2981_v4  ;;  %v2853_v13 = vld [vmem:[%s5358_s1 + $0x428] sm:$0xf]  ;;  %v3506_v14 = vld [vmem:[%s5358_s1 + $0x434] sm:$0xf0]  ;;  %v2490_v19 = vor.u32 %v3412_v9, %v2487_v10  ;;  %v2327_v30 = vld [vmem:[%s5358_s1 + $0x18] sm:$0xf0] }
  0x8d   :  { %1545 = vmatpush.bf16.msrb.mxu0 %v2554_v28  ;;  %v3534_v18 = vld [vmem:[%s5358_s1 + $0x514] sm:$0xf0]  ;;  %v2854_v22 = vor.u32 %v3506_v14, %v2853_v13  ;;  %v2837_v23 = vld [vmem:[%s5358_s1 + $0x408] sm:$0xf]  ;;  %v3528_v34 = vld [vmem:[%s5358_s1 + $0x4ec] sm:$0xf] }
  0x8e   :  { %1489 = vmatpush.bf16.msrb.mxu1 %v2934_v17  ;;  %v2965_v17 = vld [vmem:[%s5358_s1 + $0x508] sm:$0xf]  ;;  %v3502_v28 = vld [vmem:[%s5358_s1 + $0x414] sm:$0xf0]  ;;  %v2951_v35 = vld [vmem:[%s5358_s1 + $0x4f8] sm:$0xf0] }
  0x8f   :  { %1504 = vmatpush.bf16.msra.mxu3 %v3046_v21  ;;  %v2823_v21 = vld [vmem:[%s5358_s1 + $0x3f8] sm:$0xf0]  ;;  %v2966_v27 = vor.u32 %v3534_v18, %v2965_v17  ;;  %v3492_v38 = vld [vmem:[%s5358_s1 + $0x3cc] sm:$0xf]  ;;  %v2838_v40 = vor.u32 %v3502_v28, %v2837_v23  ;;  %v2954_v48 = vor.u32 %v3528_v34, %v2951_v35 }
  0x90   :  { %1531 = vmatpush.bf16.msrb.mxu2 %v2426_v20  ;;  %v3496_v20 = vld [vmem:[%s5358_s1 + $0x3ec] sm:$0xf]  ;;  %v2807_v39 = vld [vmem:[%s5358_s1 + $0x3d8] sm:$0xf0] }
  0x91   :  { %1546 = vmatpush.bf16.msrb.mxu0 %v2538_v41  ;;  %v2826_v31 = vor.u32 %v3496_v20, %v2823_v21  ;;  %v3404_v41 = vld [vmem:[%s5358_s1 + $0x10c] sm:$0xf]  ;;  %v2810_v49 = vor.u32 %v3492_v38, %v2807_v39  ;;  %v2679_v52 = vld [vmem:[%s5358_s1 + $0x2d8] sm:$0xf0] }
  0x92   :  { %1490 = vmatpush.bf16.msrb.mxu1 %v2918_v29  ;;  %v3372_v29 = vld [vmem:[%s5358_s1 + $0xc] sm:$0xf]  ;;  %v2935_v56 = vld [vmem:[%s5358_s1 + $0x4d8] sm:$0xf0] }
  0x93   :  { %1505 = vmatpush.bf16.msra.mxu3 %v3030_v33  ;;  %v2695_v33 = vld [vmem:[%s5358_s1 + $0x2f8] sm:$0xf0]  ;;  %v2330_v44 = vor.u32 %v3372_v29, %v2327_v30  ;;  %v3460_v51 = vld [vmem:[%s5358_s1 + $0x2cc] sm:$0xf] }
  0x94   :  { %1532 = vmatpush.bf16.msrb.mxu2 %v2410_v32  ;;  %3101 = vmatmul.msk.bf16.vlgmr.msra.gmra.mxu0 %vm1232_vm0, %v4084_v50  ;;  %v3464_v32 = vld [vmem:[%s5358_s1 + $0x2ec] sm:$0xf]  ;;  %v2791_v59 = vld [vmem:[%s5358_s1 + $0x3b8] sm:$0xf0] }
  0x95   :  { %1547 = vmatpush.bf16.msrb.mxu0 %v2522_v57  ;;  %v2698_v45 = vor.u32 %v3464_v32, %v2695_v33  ;;  %v3524_v53 = vld [vmem:[%s5358_s1 + $0x4cc] sm:$0xf]  ;;  %v3063_v0 = vld [vmem:[%s5358_s1 + $0x5d8] sm:$0xf0] }
  0x96   :  { %1491 = vmatpush.bf16.msrb.mxu1 %v2902_v43  ;;  %v2455_v43 = vld [vmem:[%s5358_s1 + $0x118] sm:$0xf0]  ;;  %v2938_v1 = vor.u32 %v3524_v53, %v2935_v56  ;;  %v3456_v3 = vld [vmem:[%s5358_s1 + $0x2ac] sm:$0xf] }
  0x97   :  { %1506 = vmatpush.bf16.msra.mxu3 %v3014_v47  ;;  %v3079_v47 = vld [vmem:[%s5358_s1 + $0x5f8] sm:$0xf0]  ;;  %v2458_v57 = vor.u32 %v3404_v41, %v2455_v43  ;;  %v3520_v5 = vld [vmem:[%s5358_s1 + $0x4ac] sm:$0xf] }
  0x98   :  { %1533 = vmatpush.bf16.msrb.mxu2 %v2394_v46  ;;  %v3560_v46 = vld [vmem:[%s5358_s1 + $0x5ec] sm:$0xf]  ;;  %v2663_v4 = vld [vmem:[%s5358_s1 + $0x2b8] sm:$0xf0] }
  0x99   :  { %1548 = vmatpush.bf16.msrb.mxu0 %v2506_v6  ;;  %v3082_v61 = vor.u32 %v3560_v46, %v3079_v47  ;;  %v2919_v6 = vld [vmem:[%s5358_s1 + $0x4b8] sm:$0xf0]  ;;  %v3452_v16 = vld [vmem:[%s5358_s1 + $0x28c] sm:$0xf]  ;;  %v4913_v47 = vld [vmem:[%s5362_s5] sm:$0xf] }
  0x9a   :  { %1492 = vmatpush.bf16.msrb.mxu1 %v2886_v58  ;;  %v3488_v58 = vld [vmem:[%s5358_s1 + $0x3ac] sm:$0xf]  ;;  %v2775_v9 = vld [vmem:[%s5358_s1 + $0x398] sm:$0xf0]  ;;  %v2922_v14 = vor.u32 %v3520_v5, %v2919_v6  ;;  %v244_v5 = vperm.slane %v4913_v47, 0 }
  0x9b   :  { %1507 = vmatpush.bf16.msra.mxu3 %v2998_v63  ;;  %v3556_v63 = vld [vmem:[%s5358_s1 + $0x5cc] sm:$0xf]  ;;  %v2794_v2 = vor.u32 %v3488_v58, %v2791_v59  ;;  %v3047_v13 = vld [vmem:[%s5358_s1 + $0x5b8] sm:$0xf0] }
  0x9c   :  { %1534 = vmatpush.bf16.msrb.mxu2 %v2378_v62  ;;  %v2682_v62 = vor.u32 %v3460_v51, %v2679_v52  ;;  %v3066_v10 = vor.u32 %v3556_v63, %v3063_v0  ;;  %v3516_v17 = vld [vmem:[%s5358_s1 + $0x48c] sm:$0xf]  ;;  %v2903_v18 = vld [vmem:[%s5358_s1 + $0x498] sm:$0xf0] }
  0x9d   :  { %1549 = vmatpush.bf16.msrb.mxu0 %v2490_v19  ;;  %v3480_v19 = vld [vmem:[%s5358_s1 + $0x36c] sm:$0xf]  ;;  %v2759_v20 = vld [vmem:[%s5358_s1 + $0x378] sm:$0xf0]  ;;  %v2906_v25 = vor.u32 %v3516_v17, %v2903_v18 }
  0x9e   :  { %1493 = vmatpush.bf16.msrb.mxu1 %v2870_v7  ;;  %v3484_v7 = vld [vmem:[%s5358_s1 + $0x38c] sm:$0xf]  ;;  %v3031_v24 = vld [vmem:[%s5358_s1 + $0x598] sm:$0xf0] }
  0x9f   :  { %1508 = vmatpush.bf16.msra.mxu3 %v2982_v12  ;;  %v3552_v12 = vld [vmem:[%s5358_s1 + $0x5ac] sm:$0xf]  ;;  %v2778_v15 = vor.u32 %v3484_v7, %v2775_v9  ;;  %v2887_v29 = vld [vmem:[%s5358_s1 + $0x478] sm:$0xf0] }
  0xa0   :  { %1535 = vmatpush.bf16.msrb.mxu2 %v2362_v11  ;;  %v2666_v11 = vor.u32 %v3456_v3, %v2663_v4  ;;  %v3050_v21 = vor.u32 %v3552_v12, %v3047_v13  ;;  %v3548_v23 = vld [vmem:[%s5358_s1 + $0x58c] sm:$0xf]  ;;  %v3015_v35 = vld [vmem:[%s5358_s1 + $0x578] sm:$0xf0]  ;;  %v3161_v3 = vld [vmem:[%s5359_s2 + $0x70] sm:$0xf] }
  0xa1   :  { %1550 = vmatpush.bf16.msrb.mxu0 %v2474_v36  ;;  %v3512_v28 = vld [vmem:[%s5358_s1 + $0x46c] sm:$0xf]  ;;  %v3034_v32 = vor.u32 %v3548_v23, %v3031_v24  ;;  %v2871_v43 = vld [vmem:[%s5358_s1 + $0x458] sm:$0xf0]  ;;  %v3582_v4 = vld [vmem:[%s5359_s2 + $0x74] sm:$0xf0] }
  0xa2   :  { %1494 = vmatpush.bf16.msrb.mxu1 %v2854_v22  ;;  %v3476_v30 = vld [vmem:[%s5358_s1 + $0x34c] sm:$0xf]  ;;  %v2890_v36 = vor.u32 %v3512_v28, %v2887_v29  ;;  %v2999_v51 = vld [vmem:[%s5358_s1 + $0x558] sm:$0xf0] }
  0xa3   :  { %1509 = vmatpush.bf16.msra.mxu3 %v2966_v27  ;;  %v2631_v27 = vld [vmem:[%s5358_s1 + $0x278] sm:$0xf0]  ;;  %v3544_v34 = vld [vmem:[%s5358_s1 + $0x56c] sm:$0xf] }
  0xa4   :  { %1536 = vmatpush.bf16.msrb.mxu2 %v2346_v26  ;;  %v2762_v26 = vor.u32 %v3480_v19, %v2759_v20  ;;  %v3444_v39 = vld [vmem:[%s5358_s1 + $0x24c] sm:$0xf]  ;;  %v3018_v46 = vor.u32 %v3544_v34, %v3015_v35  ;;  %v1245_v52 = vpop.f32.mrf.mxu0  ;;  %v2599_v59 = vld [vmem:[%s5358_s1 + $0x238] sm:$0xf0]  ;;  %v3153_v19 = vld [vmem:[%s5359_s2 + $0x60] sm:$0xf] }
  0xa5   :  { %1551 = vmatpush.bf16.msrb.mxu0 %v2458_v57  ;;  %v3508_v41 = vld [vmem:[%s5358_s1 + $0x44c] sm:$0xf]  ;;  %v2855_v63 = vld [vmem:[%s5358_s1 + $0x438] sm:$0xf0]  ;;  %v3580_v20 = vld [vmem:[%s5359_s2 + $0x64] sm:$0xf0]  ;;  %v1246_v24 = vadd.f32 %v1245_v52, %v244_v5 }
  0xa6   :  { %1495 = vmatpush.bf16.msrb.mxu1 %v2838_v40  ;;  %1510 = vmatmul.bf16.vlgmr.msra.gmra.mxu3 %v4192_v42  ;;  %v2615_v40 = vld [vmem:[%s5358_s1 + $0x258] sm:$0xf0]  ;;  %v2874_v56 = vor.u32 %v3508_v41, %v2871_v43  ;;  %v3440_v58 = vld [vmem:[%s5358_s1 + $0x22c] sm:$0xf] }
  0xa7   :  { %1572 = vmatpush.bf16.msrb.mxu3 %v2826_v31  ;;  %v2743_v31 = vld [vmem:[%s5358_s1 + $0x358] sm:$0xf0]  ;;  %v3468_v0 = vld [vmem:[%s5358_s1 + $0x30c] sm:$0xf]  ;;  %v2602_v6 = vor.u32 %v3440_v58, %v2599_v59 }
  0xa8   :  { %1537 = vmatpush.bf16.msrb.mxu2 %v2330_v44  ;;  %1552 = vmatmul.bf16.vlgmr.msrb.gmra.mxu0 %v3993_v8  ;;  %v3448_v8 = vld [vmem:[%s5358_s1 + $0x26c] sm:$0xf]  ;;  %v2746_v38 = vor.u32 %v3476_v30, %v2743_v31  ;;  %v2983_v9 = vld [vmem:[%s5358_s1 + $0x538] sm:$0xf0]  ;;  %v3145_v30 = vld [vmem:[%s5359_s2 + $0x50] sm:$0xf] }
  0xa9   :  { %1496 = vmatmul.bf16.vlgmr.msrb.gmra.mxu1 %v4181_v37  ;;  %1600 = vmatpush.bf16.msra.mxu0 %v3082_v61  ;;  %v2634_v33 = vor.u32 %v3448_v8, %v2631_v27  ;;  %v3472_v44 = vld [vmem:[%s5358_s1 + $0x32c] sm:$0xf]  ;;  %v4921_v53 = vpop.f32.mrf.mxu2  ;;  %v2583_v13 = vld [vmem:[%s5358_s1 + $0x218] sm:$0xf0]  ;;  %v3154_v8 = vor.u32 %v3580_v20, %v3153_v19  ;;  %v3578_v31 = vld [vmem:[%s5359_s2 + $0x54] sm:$0xf0] }
  0xaa   :  { %1558 = vmatpush.bf16.msra.mxu1 %v2698_v45  ;;  %v2727_v45 = vld [vmem:[%s5358_s1 + $0x338] sm:$0xf0]  ;;  %v3504_v61 = vld [vmem:[%s5358_s1 + $0x42c] sm:$0xf]  ;;  %v3581_v19 = vld [vmem:[%s5359_s2 + $0x74] sm:$0xf] }
  0xab   :  { %1573 = vmatpush.bf16.msrb.mxu3 %v2810_v49  ;;  %1538 = vmatmul.bf16.vlgmr.msrb.gmra.mxu2 %v3957_v55  ;;  %v2647_v55 = vld [vmem:[%s5358_s1 + $0x298] sm:$0xf0]  ;;  %v3540_v49 = vld [vmem:[%s5358_s1 + $0x54c] sm:$0xf]  ;;  %v2730_v57 = vor.u32 %v3472_v44, %v2727_v45  ;;  %v1287_v34 = vpop.f32.mrf.mxu3 }
  0xac   :  { %1586 = vmatpush.bf16.msra.mxu2 %v2954_v48  ;;  %v2650_v22 = vor.u32 %v3452_v16, %v2647_v55  ;;  %v2618_v48 = vor.u32 %v3444_v39, %v2615_v40  ;;  %v3536_v7 = vld [vmem:[%s5358_s1 + $0x52c] sm:$0xf]  ;;  %v2839_v16 = vld [vmem:[%s5358_s1 + $0x418] sm:$0xf0]  ;;  %v1247_v27 = vpop.f32.mrf.mxu0  ;;  %v3576_v39 = vld [vmem:[%s5359_s2 + $0x44] sm:$0xf0] }
  0xad   :  { %1601 = vmatpush.bf16.msra.mxu0 %v3066_v10  ;;  %v2858_v10 = vor.u32 %v3504_v61, %v2855_v63  ;;  %v3436_v12 = vld [vmem:[%s5358_s1 + $0x20c] sm:$0xf]  ;;  %v3095_v17 = vld [vmem:[%s5358_s1 + $0x618] sm:$0xf0]  ;;  %v2986_v18 = vor.u32 %v3536_v7, %v2983_v9  ;;  %v1248_v35 = vadd.f32 %v1247_v27, %v244_v5  ;;  %v3598_v40 = vld [vmem:[%s5359_s2 + $0xf4] sm:$0xf0] }
  0xae   :  { %1559 = vmatpush.bf16.msra.mxu1 %v2682_v62  ;;  %v1259_v62 = vpop.f32.mrf.mxu1  ;;  %v3564_v55 = vld [vmem:[%s5358_s1 + $0x60c] sm:$0xf]  ;;  %v2967_v23 = vld [vmem:[%s5358_s1 + $0x518] sm:$0xf0]  ;;  %v3121_v61 = vld [vmem:[%s5359_s2 + $0x20] sm:$0xf] }
  0xaf   :  { %1574 = vmatpush.bf16.msrb.mxu3 %v2794_v2  ;;  %v3002_v2 = vor.u32 %v3540_v49, %v2999_v51  ;;  %v3217_v51 = vld [vmem:[%s5359_s2 + $0xe0] sm:$0xf]  ;;  %v3209_v63 = vld [vmem:[%s5359_s2 + $0xd0] sm:$0xf]  ;;  %v3570_v7 = vld [vmem:[%s5359_s2 + $0x14] sm:$0xf0] }
  0xb0   :  { %1587 = vmatpush.bf16.msra.mxu2 %v2938_v1  ;;  %v2711_v1 = vld [vmem:[%s5358_s1 + $0x318] sm:$0xf0]  ;;  %v3579_v27 = vld [vmem:[%s5359_s2 + $0x64] sm:$0xf] }
  0xb1   :  { %1602 = vmatpush.bf16.msra.mxu0 %v3050_v21  ;;  %v2586_v21 = vor.u32 %v3436_v12, %v2583_v13  ;;  %v1275_v28 = vpop.f32.mrf.mxu2  ;;  %v3592_v12 = vld [vmem:[%s5359_s2 + $0xc4] sm:$0xf0] }
  0xb2   :  { %1560 = vmatpush.bf16.msra.mxu1 %v2666_v11  ;;  %v2714_v11 = vor.u32 %v3468_v0, %v2711_v1  ;;  %v3594_v0 = vld [vmem:[%s5359_s2 + $0xd4] sm:$0xf0] }
  0xb3   :  { %1575 = vmatpush.bf16.msrb.mxu3 %v2778_v15  ;;  %v3162_v15 = vor.u32 %v3582_v4, %v3161_v3  ;;  %v1289_v58 = vpop.f32.mrf.mxu3  ;;  %v3210_v1 = vor.u32 %v3594_v0, %v3209_v63 }
  0xb4   :  { %1588 = vmatpush.bf16.msra.mxu2 %v2922_v14  ;;  %v3500_v14 = vld [vmem:[%s5358_s1 + $0x40c] sm:$0xf] }
  0xb5   :  { %1603 = vmatpush.bf16.msra.mxu0 %v3034_v32 }
  0xb6   :  { %1561 = vmatpush.bf16.msra.mxu1 %v2650_v22  ;;  %v3532_v22 = vld [vmem:[%s5358_s1 + $0x50c] sm:$0xf]  ;;  %v1261_v32 = vpop.f32.mrf.mxu1 }
  0xb7   :  { %1576 = vmatpush.bf16.msrb.mxu3 %v2762_v26  ;;  %v3098_v26 = vor.u32 %v3564_v55, %v3095_v17  ;;  %v2970_v29 = vor.u32 %v3532_v22, %v2967_v23  ;;  %v1262_v43 = vadd.f32 %v1261_v32, %v1248_v35  ;;  %v3105_v17 = vld [vmem:[%s5359_s2] sm:$0xf]  ;;  %v3590_v22 = vld [vmem:[%s5359_s2 + $0xb4] sm:$0xf0] }
  0xb8   :  { %1589 = vmatpush.bf16.msra.mxu2 %v2906_v25  ;;  %v2842_v25 = vor.u32 %v3500_v14, %v2839_v16 }
  0xb9   :  { %1604 = vmatpush.bf16.msra.mxu0 %v3018_v46  ;;  %v1329_v46 = vpop.f32.mrf.mxu2 }
  0xba   :  { %1562 = vmatpush.bf16.msra.mxu1 %v2634_v33  ;;  %v1260_v33 = vadd.f32 %v1259_v62, %v1246_v24  ;;  %v3572_v62 = vld [vmem:[%s5359_s2 + $0x24] sm:$0xf0] }
  0xbb   :  { %1577 = vmatpush.bf16.msrb.mxu3 %v2746_v38  ;;  %v3137_v38 = vld [vmem:[%s5359_s2 + $0x40] sm:$0xf]  ;;  %v3122_v3 = vor.u32 %v3572_v62, %v3121_v61  ;;  %v3123_v61 = vld [vmem:[%s5359_s2 + $0x28] sm:$0xf0] }
  0xbc   :  { %1590 = vmatpush.bf16.msra.mxu2 %v2890_v36  ;;  %v3146_v36 = vor.u32 %v3578_v31, %v3145_v30  ;;  %v3138_v44 = vor.u32 %v3576_v39, %v3137_v38  ;;  %v3185_v30 = vld [vmem:[%s5359_s2 + $0xa0] sm:$0xf]  ;;  %v3588_v31 = vld [vmem:[%s5359_s2 + $0xa4] sm:$0xf0]  ;;  %v3147_v38 = vld [vmem:[%s5359_s2 + $0x58] sm:$0xf0] }
  0xbd   :  { %1605 = vmatpush.bf16.msra.mxu0 %v3002_v2  ;;  %v3177_v39 = vld [vmem:[%s5359_s2 + $0x90] sm:$0xf] }
  0xbe   :  { %1563 = vmatpush.bf16.msra.mxu1 %v2618_v48  ;;  %v3574_v48 = vld [vmem:[%s5359_s2 + $0x34] sm:$0xf0] }
  0xbf   :  { %1578 = vmatpush.bf16.msrb.mxu3 %v2730_v57 }
  0xc0   :  { %1591 = vmatpush.bf16.msra.mxu2 %v2874_v56  ;;  %v1276_v56 = vadd.f32 %v1275_v28, %v1262_v43  ;;  %v3139_v43 = vld [vmem:[%s5359_s2 + $0x48] sm:$0xf0] }
  0xc1   :  { %1606 = vmatpush.bf16.msra.mxu0 %v2986_v18  ;;  %v1301_v45 = vpop.f32.mrf.mxu0  ;;  %v1331_v13 = vpop.f32.mrf.mxu2  ;;  %v3568_v18 = vld [vmem:[%s5359_s2 + $0x4] sm:$0xf0] }
  0xc2   :  { %1564 = vmatpush.bf16.msra.mxu1 %v2602_v6  ;;  %v1315_v49 = vpop.f32.mrf.mxu1  ;;  %v1290_v2 = vadd.f32 %v1289_v58, %v1276_v56  ;;  %v3113_v6 = vld [vmem:[%s5359_s2 + $0x10] sm:$0xf] }
  0xc3   :  { %1579 = vmatpush.bf16.msrb.mxu3 %v2714_v11  ;;  %v3201_v11 = vld [vmem:[%s5359_s2 + $0xc0] sm:$0xf]  ;;  %v3114_v16 = vor.u32 %v3570_v7, %v3113_v6 }
  0xc4   :  { %1592 = vmatpush.bf16.msra.mxu2 %v2858_v10  ;;  %v3202_v14 = vor.u32 %v3592_v12, %v3201_v11  ;;  %v3567_v11 = vld [vmem:[%s5359_s2 + $0x4] sm:$0xf]  ;;  %v3107_v12 = vld [vmem:[%s5359_s2 + $0x8] sm:$0xf0] }
  0xc5   :  { %1607 = vmatpush.bf16.msra.mxu0 %v2970_v29  ;;  %v3155_v29 = vld [vmem:[%s5359_s2 + $0x68] sm:$0xf0] }
  0xc6   :  { %1565 = vmatpush.bf16.msra.mxu1 %v2586_v21  ;;  %1580 = vmatmul.bf16.vlgmr.msrb.gmra.mxu3 %v3968_v60  ;;  %v3225_v60 = vld [vmem:[%s5359_s2 + $0xf0] sm:$0xf]  ;;  %v3163_v21 = vld [vmem:[%s5359_s2 + $0x78] sm:$0xf0]  ;;  %v3158_v35 = vor.u32 %v3579_v27, %v3155_v29  ;;  %v3283_v27 = vld [vmem:[%s5359_s2 + $0x168] sm:$0xf0] }
  0xc7   :  { %1951 = vmatpush.bf16.msra.mxu3 %v3162_v15  ;;  %v3226_v41 = vor.u32 %v3598_v40, %v3225_v60  ;;  %v3586_v60 = vld [vmem:[%s5359_s2 + $0x94] sm:$0xf0] }
  0xc8   :  { %1593 = vmatpush.bf16.msra.mxu2 %v2842_v25  ;;  %1608 = vmatmul.bf16.vlgmr.msra.gmra.mxu0 %v4192_v42  ;;  %v3596_v42 = vld [vmem:[%s5359_s2 + $0xe4] sm:$0xf0]  ;;  %v3106_v25 = vor.u32 %v3568_v18, %v3105_v17  ;;  %v3178_v40 = vor.u32 %v3586_v60, %v3177_v39 }
  0xc9   :  { %1566 = vmatmul.bf16.vlgmr.msra.gmra.mxu1 %v3955_v54  ;;  %v1274_v54 = vadd.f32 %v4921_v53, %v1260_v33  ;;  %v3218_v53 = vor.u32 %v3596_v42, %v3217_v51  ;;  %v1303_v5 = vpop.f32.mrf.mxu0  ;;  %v1343_v28 = vpop.f32.mrf.mxu3  ;;  %v3186_v33 = vor.u32 %v3588_v31, %v3185_v30  ;;  %v3573_v42 = vld [vmem:[%s5359_s2 + $0x34] sm:$0xf] }
  0xca   :  { %1621 = vmatpush.bf16.msrb.mxu1 %v3098_v26  ;;  %v1304_v9 = vadd.f32 %v1303_v5, %v1290_v2  ;;  %v1317_v10 = vpop.f32.mrf.mxu1  ;;  %v3569_v2 = vld [vmem:[%s5359_s2 + $0x14] sm:$0xf] }
  0xcb   :  { %1952 = vmatpush.bf16.msra.mxu3 %v3154_v8  ;;  %1594 = vmatmul.bf16.vlgmr.msra.gmra.mxu2 %v4181_v37  ;;  %v3129_v37 = vld [vmem:[%s5359_s2 + $0x30] sm:$0xf]  ;;  %v1288_v52 = vadd.f32 %v1287_v34, %v1274_v54  ;;  %v3166_v8 = vor.u32 %v3581_v19, %v3163_v21  ;;  %v3613_v21 = vld [vmem:[%s5359_s2 + $0x174] sm:$0xf] }
  0xcc   :  { %v3130_v57 = vor.u32 %v3574_v48, %v3129_v37  ;;  %v1318_v15 = vadd.f32 %v1317_v10, %v1304_v9  ;;  %v3289_v19 = vld [vmem:[%s5359_s2 + $0x170] sm:$0xf] }
  0xcd   :  { %v1302_v59 = vadd.f32 %v1301_v45, %v1288_v52  ;;  %v3584_v45 = vld [vmem:[%s5359_s2 + $0x84] sm:$0xf0]  ;;  %v3131_v52 = vld [vmem:[%s5359_s2 + $0x38] sm:$0xf0] }
  0xce   :  { %1965 = vmatpush.bf16.msra.mxu1 %v3226_v41  ;;  %v1332_v20 = vadd.f32 %v1331_v13, %v1318_v15  ;;  %v1357_v34 = vpop.f32.mrf.mxu2  ;;  %v3575_v41 = vld [vmem:[%s5359_s2 + $0x44] sm:$0xf] }
  0xcf   :  { %1953 = vmatpush.bf16.msra.mxu3 %v3146_v36  ;;  %v1316_v4 = vadd.f32 %v1315_v49, %v1302_v59  ;;  %v3577_v36 = vld [vmem:[%s5359_s2 + $0x54] sm:$0xf]  ;;  %v3142_v48 = vor.u32 %v3575_v41, %v3139_v43  ;;  %v245_v49 = vperm.slane %v4913_v47, 1  ;;  %v3571_v59 = vld [vmem:[%s5359_s2 + $0x24] sm:$0xf] }
  0xd0   :  { %v1632_v24 = vmax.f32 %v1332_v20, 0.0  ;;  %v3150_v54 = vor.u32 %v3577_v36, %v3147_v38  ;;  %v3126_v63 = vor.u32 %v3571_v59, %v3123_v61  ;;  %v3614_v20 = vld [vmem:[%s5359_s2 + $0x174] sm:$0xf0]  ;;  %v3275_v36 = vld [vmem:[%s5359_s2 + $0x158] sm:$0xf0] }
  0xd1   :  { %v1330_v55 = vadd.f32 %v1329_v46, %v1316_v4  ;;  %v1345_v37 = vpop.f32.mrf.mxu3  ;;  %v1344_v58 = vadd.f32 %v1343_v28, %v245_v49  ;;  %v3249_v59 = vld [vmem:[%s5359_s2 + $0x120] sm:$0xf]  ;;  %v3604_v61 = vld [vmem:[%s5359_s2 + $0x124] sm:$0xf0] }
  0xd2   :  { %1966 = vmatpush.bf16.msra.mxu1 %v3218_v53  ;;  %v1346_v62 = vadd.f32 %v1345_v37, %v245_v49  ;;  %v3607_v37 = vld [vmem:[%s5359_s2 + $0x144] sm:$0xf]  ;;  %v3267_v49 = vld [vmem:[%s5359_s2 + $0x148] sm:$0xf0] }
  0xd3   :  { %1954 = vmatpush.bf16.msra.mxu3 %v3138_v44  ;;  %v1628_v26 = vmax.f32 %v1330_v55, 0.0  ;;  %v3169_v44 = vld [vmem:[%s5359_s2 + $0x80] sm:$0xf]  ;;  %v1358_v0 = vadd.f32 %v1357_v34, %v1344_v58  ;;  %v3610_v34 = vld [vmem:[%s5359_s2 + $0x154] sm:$0xf0] }
  0xd4   :  { %v3170_v46 = vor.u32 %v3584_v45, %v3169_v44  ;;  %v3265_v45 = vld [vmem:[%s5359_s2 + $0x140] sm:$0xf] }
  0xd5   :  { %v5075_v32 = vpack.c.bf16 %v1632_v24, %v1628_v26  ;;  %v3612_v24 = vld [vmem:[%s5359_s2 + $0x164] sm:$0xf0] }
  0xd6   :  { %1967 = vmatpush.bf16.msra.mxu1 %v3210_v1  ;;  %v1359_v51 = vpop.f32.mrf.mxu2 }
  0xd7   :  { %1955 = vmatpush.bf16.msra.mxu3 %v3130_v57  ;;  %v3134_v57 = vor.u32 %v3573_v42, %v3131_v52  ;;  %v1360_v5 = vadd.f32 %v1359_v51, %v1346_v62  ;;  %v3270_v51 = vor.u32 %v3607_v37, %v3267_v49  ;;  %v3257_v42 = vld [vmem:[%s5359_s2 + $0x130] sm:$0xf]  ;;  %v3606_v52 = vld [vmem:[%s5359_s2 + $0x134] sm:$0xf0]  ;;  %v3603_v62 = vld [vmem:[%s5359_s2 + $0x124] sm:$0xf] }
  0xd8   :  { %v3595_v49 = vld [vmem:[%s5359_s2 + $0xe4] sm:$0xf] }
  0xd9   :  { %3102 = vmatmul.msk.bf16.vlgmr.msrb.gmra.mxu1 %vm1232_vm0, %v4084_v50  ;;  %v3193_v50 = vld [vmem:[%s5359_s2 + $0xb0] sm:$0xf] }
  0xda   :  { %1968 = vmatpush.bf16.msra.mxu1 %v3202_v14  ;;  %v3194_v23 = vor.u32 %v3590_v22, %v3193_v50  ;;  %v3110_v14 = vor.u32 %v3567_v11, %v3107_v12  ;;  %v3290_v50 = vor.u32 %v3614_v20, %v3289_v19  ;;  %v3291_v22 = vld [vmem:[%s5359_s2 + $0x178] sm:$0xf0]  ;;  %v3233_v11 = vld [vmem:[%s5359_s2 + $0x100] sm:$0xf]  ;;  %v3600_v12 = vld [vmem:[%s5359_s2 + $0x104] sm:$0xf0] }
  0xdb   :  { %1956 = vmatpush.bf16.msra.mxu3 %v3122_v3  ;;  %v3115_v3 = vld [vmem:[%s5359_s2 + $0x18] sm:$0xf0]  ;;  %v3294_v26 = vor.u32 %v3613_v21, %v3291_v22 }
  0xdc   :  { %v3118_v9 = vor.u32 %v3569_v2, %v3115_v3  ;;  %1979 = vmatpush.bf16.msrb.mxu2 %v3290_v50  ;;  %v3241_v2 = vld [vmem:[%s5359_s2 + $0x110] sm:$0xf]  ;;  %v3602_v3 = vld [vmem:[%s5359_s2 + $0x114] sm:$0xf0] }
  0xde   :  { %1969 = vmatpush.bf16.msra.mxu1 %v3194_v23  ;;  %v3281_v23 = vld [vmem:[%s5359_s2 + $0x160] sm:$0xf] }
  0xdf   :  { %1957 = vmatpush.bf16.msra.mxu3 %v3114_v16  ;;  %v3282_v29 = vor.u32 %v3612_v24, %v3281_v23 }
  0xe1   :  { %v1371_v53 = vpop.f32.mrf.mxu0  ;;  %1980 = vmatpush.bf16.msrb.mxu2 %v3282_v29 }
  0xe2   :  { %1970 = vmatpush.bf16.msra.mxu1 %v3186_v33  ;;  %v1385_v56 = vpop.f32.mrf.mxu1  ;;  %v1372_v10 = vadd.f32 %v1371_v53, %v1358_v0  ;;  %v3273_v33 = vld [vmem:[%s5359_s2 + $0x150] sm:$0xf]  ;;  %v3605_v53 = vld [vmem:[%s5359_s2 + $0x134] sm:$0xf]  ;;  %v3251_v0 = vld [vmem:[%s5359_s2 + $0x128] sm:$0xf0] }
  0xe3   :  { %1958 = vmatpush.bf16.msra.mxu3 %v3106_v25  ;;  %v3274_v60 = vor.u32 %v3610_v34, %v3273_v33  ;;  %v1688_v34 = vld [vmem:[%s5359_s2 + $0x180] sm:$0x77] }
  0xe4   :  { %v1386_v15 = vadd.f32 %v1385_v56, %v1372_v10  ;;  %v3258_v56 = vor.u32 %v3606_v52, %v3257_v42 }
  0xe5   :  { %1981 = vmatpush.bf16.msrb.mxu2 %v3274_v60 }
  0xe6   :  { %1959 = vmatmul.bf16.vlgmr.msra.gmra.mxu3 %v5075_v32  ;;  %1971 = vmatpush.bf16.msra.mxu1 %v3178_v40 }
  0xe7   :  { %2007 = vmatpush.bf16.msrb.mxu3 %v3166_v8  ;;  %v3611_v8 = vld [vmem:[%s5359_s2 + $0x164] sm:$0xf] }
  0xe8   :  { %v3286_v31 = vor.u32 %v3611_v8, %v3283_v27 }
  0xe9   :  { %v1373_v6 = vpop.f32.mrf.mxu0 }
  0xea   :  { %1972 = vmatpush.bf16.msra.mxu1 %v3170_v46  ;;  %v1387_v4 = vpop.f32.mrf.mxu1  ;;  %v1374_v13 = vadd.f32 %v1373_v6, %v1360_v5  ;;  %v3608_v46 = vld [vmem:[%s5359_s2 + $0x144] sm:$0xf0]  ;;  %v3242_v5 = vor.u32 %v3602_v3, %v3241_v2  ;;  %v3243_v6 = vld [vmem:[%s5359_s2 + $0x118] sm:$0xf0] }
  0xeb   :  { %2008 = vmatpush.bf16.msrb.mxu3 %v3158_v35  ;;  %v1399_v1 = vpop.f32.mrf.mxu3  ;;  %v3609_v35 = vld [vmem:[%s5359_s2 + $0x154] sm:$0xf] }
  0xec   :  { %v1400_v17 = vadd.f32 %v1399_v1, %v1386_v15  ;;  %v1388_v18 = vadd.f32 %v1387_v4, %v1374_v13  ;;  %v3254_v1 = vor.u32 %v3603_v62, %v3251_v0  ;;  %v3601_v4 = vld [vmem:[%s5359_s2 + $0x114] sm:$0xf]  ;;  %v3599_v13 = vld [vmem:[%s5359_s2 + $0x104] sm:$0xf]  ;;  %v3235_v15 = vld [vmem:[%s5359_s2 + $0x108] sm:$0xf0] }
  0xed   :  { %v3591_v0 = vld [vmem:[%s5359_s2 + $0xc4] sm:$0xf] }
  0xee   :  { %v1413_v7 = vpop.f32.mrf.mxu2  ;;  %2035 = vmatpush.bf16.msrb.mxu1 %v3294_v26 }
  0xef   :  { %2009 = vmatpush.bf16.msrb.mxu3 %v3150_v54  ;;  %v1414_v30 = vadd.f32 %v1413_v7, %v1400_v17  ;;  %v3278_v54 = vor.u32 %v3609_v35, %v3275_v36  ;;  %v3246_v7 = vor.u32 %v3601_v4, %v3243_v6  ;;  %v246_v17 = vperm.slane %v4913_v47, 2  ;;  %v3589_v6 = vld [vmem:[%s5359_s2 + $0xb4] sm:$0xf] }
  0xf2   :  { %v1427_v55 = vpop.f32.mrf.mxu1  ;;  %2036 = vmatpush.bf16.msrb.mxu1 %v3286_v31 }
  0xf3   :  { %2010 = vmatpush.bf16.msrb.mxu3 %v3142_v48  ;;  %v1401_v16 = vpop.f32.mrf.mxu3  ;;  %v1428_v38 = vadd.f32 %v1427_v55, %v1414_v30  ;;  %v3266_v48 = vor.u32 %v3608_v46, %v3265_v45  ;;  %v3238_v55 = vor.u32 %v3599_v13, %v3235_v15  ;;  %v3587_v13 = vld [vmem:[%s5359_s2 + $0xa4] sm:$0xf] }
  0xf4   :  { %v1402_v25 = vadd.f32 %v1401_v16, %v1388_v18 }
  0xf5   :  { %v1629_v41 = vmax.f32 %v1428_v38, 0.0  ;;  %1982 = vmatpush.bf16.msrb.mxu2 %v3266_v48  ;;  %v1840_v38 = vunpack.c.l.b16 %v1688_v34 }
  0xf6   :  { %v1415_v28 = vpop.f32.mrf.mxu2  ;;  %2037 = vmatpush.bf16.msrb.mxu1 %v3278_v54  ;;  %v3597_v54 = vld [vmem:[%s5359_s2 + $0xf4] sm:$0xf] }
  0xf7   :  { %2011 = vmatpush.bf16.msrb.mxu3 %v3134_v57  ;;  %v3259_v57 = vld [vmem:[%s5359_s2 + $0x138] sm:$0xf0] }
  0xf8   :  { %v3262_v58 = vor.u32 %v3605_v53, %v3259_v57 }
  0xf9   :  { %1983 = vmatpush.bf16.msrb.mxu2 %v3258_v56 }
  0xfa   :  { %v1429_v39 = vpop.f32.mrf.mxu1  ;;  %2038 = vmatpush.bf16.msrb.mxu1 %v3270_v51  ;;  %v3219_v51 = vld [vmem:[%s5359_s2 + $0xe8] sm:$0xf0] }
  0xfb   :  { %2012 = vmatpush.bf16.msrb.mxu3 %v3126_v63  ;;  %v3250_v63 = vor.u32 %v3604_v61, %v3249_v59  ;;  %v3222_v53 = vor.u32 %v3595_v49, %v3219_v51  ;;  %v3211_v59 = vld [vmem:[%s5359_s2 + $0xd8] sm:$0xf0]  ;;  %v3617_v49 = vld [vmem:[%s5360_s3 + $0x10] sm:$0xff]  ;;  %v3616_v51 = vld [vmem:[%s5360_s3 + $0x8] sm:$0xff] }
  0xfd   :  { %1984 = vmatpush.bf16.msrb.mxu2 %v3250_v63  ;;  %v1841_v63 = vunpack.c.h.b16 %v1688_v34 }
  0xfe   :  { %2039 = vmatpush.bf16.msrb.mxu1 %v3262_v58  ;;  %v3593_v58 = vld [vmem:[%s5359_s2 + $0xd4] sm:$0xf] }
  0xff   :  { %2013 = vmatpush.bf16.msrb.mxu3 %v3118_v9  ;;  %v3214_v61 = vor.u32 %v3593_v58, %v3211_v59  ;;  %v1891_v2 = vpack.c.b16 %v1841_v63, %v1841_v63 }
 0x101   :  { %1985 = vmatpush.bf16.msrb.mxu2 %v3242_v5  ;;  %v1469_v10 = vpop.f32.mrf.mxu0  ;;  %v1949_v4 = vsel %vm1944_vm1, %v1891_v2, 0  ;;  %v247_v5 = vperm.slane %v4913_v47, 3  ;;  %v3187_v47 = vld [vmem:[%s5359_s2 + $0xa8] sm:$0xf0]  ;;  %v1689_v2 = vld [vmem:[%s5362_s5 + $0x4] sm:$0x3] }
 0x102   :  { %2040 = vmatpush.bf16.msrb.mxu1 %v3254_v1  ;;  %v3203_v1 = vld [vmem:[%s5359_s2 + $0xc8] sm:$0xf0]  ;;  %v3190_v15 = vor.u32 %v3587_v13, %v3187_v47 }
 0x103   :  { %2014 = vmatpush.bf16.msrb.mxu3 %v3110_v14  ;;  %v3234_v14 = vor.u32 %v3600_v12, %v3233_v11  ;;  %v3206_v3 = vor.u32 %v3591_v0, %v3203_v1  ;;  %v3625_v0 = vld [vmem:[%s5360_s3 + $0x50] sm:$0xff] }
 0x105   :  { %1986 = vmatpush.bf16.msrb.mxu2 %v3234_v14 }
 0x106   :  { %2015 = vmatmul.bf16.vlgmr.msrb.gmra.mxu3 %v5075_v32  ;;  %v1416_v32 = vadd.f32 %v1415_v28, %v1402_v25  ;;  %v1441_v9 = vpop.f32.mrf.mxu1  ;;  %2041 = vmatpush.bf16.msrb.mxu1 %v3246_v7  ;;  %v3195_v7 = vld [vmem:[%s5359_s2 + $0xb8] sm:$0xf0] }
 0x107   :  { %v1442_v18 = vadd.f32 %v1441_v9, %v246_v17 }
 0x108   :  { %v1430_v40 = vadd.f32 %v1429_v39, %v1416_v32  ;;  %v1890_v39 = vpack.c.b16 %v1840_v38, %v1840_v38 }
 0x109   :  { %v1455_v16 = vpop.f32.mrf.mxu3  ;;  %v1471_v20 = vpop.f32.mrf.mxu0  ;;  %2056 = vmatpush.bf16.msra.mxu2 %v1949_v4  ;;  %v3624_v4 = vld [vmem:[%s5360_s3 + $0x48] sm:$0xff] }
 0x10a   :  { %v1633_v43 = vmax.f32 %v1430_v40, 0.0  ;;  %2042 = vmatpush.bf16.msrb.mxu1 %v3238_v55  ;;  %v1456_v21 = vadd.f32 %v1455_v16, %v1442_v18  ;;  %v1946_v46 = vsel %vm1944_vm1, %v1890_v39, 0  ;;  %v3585_v18 = vld [vmem:[%s5359_s2 + $0x94] sm:$0xf] }
 0x10b   :  { %2000 = vmatpush.bf16.msrb.mxu0 %v1946_v46  ;;  %v3621_v46 = vld [vmem:[%s5360_s3 + $0x30] sm:$0xff] }
 0x10c   :  { %v5164_v44 = vpack.c.bf16 %v1633_v43, %v1629_v41  ;;  %v1470_v24 = vadd.f32 %v1469_v10, %v1456_v21  ;;  %v3227_v41 = vld [vmem:[%s5359_s2 + $0xf8] sm:$0xf0]  ;;  %v3198_v10 = vor.u32 %v3589_v6, %v3195_v7  ;;  %v3623_v6 = vld [vmem:[%s5360_s3 + $0x40] sm:$0xff] }
 0x10d   :  { %v3230_v37 = vor.u32 %v3597_v54, %v3227_v41 }
 0x10e   :  { %1973 = vmatmul.bf16.vlgmr.msra.gmra.mxu1 %v5164_v44  ;;  %v1443_v19 = vpop.f32.mrf.mxu1  ;;  %v1483_v50 = vpop.f32.mrf.mxu2 }
 0x10f   :  { %v1444_v22 = vadd.f32 %v1443_v19, %v246_v17  ;;  %v1484_v27 = vadd.f32 %v1483_v50, %v1470_v24  ;;  %2021 = vmatpush.bf16.msra.mxu0 %v3230_v37  ;;  %v3179_v19 = vld [vmem:[%s5359_s2 + $0x98] sm:$0xf0]  ;;  %v3583_v24 = vld [vmem:[%s5359_s2 + $0x84] sm:$0xf]  ;;  %v3620_v37 = vld [vmem:[%s5360_s3 + $0x28] sm:$0xff] }
 0x110   :  { %v3182_v21 = vor.u32 %v3585_v18, %v3179_v19 }
 0x111   :  { %v1457_v23 = vpop.f32.mrf.mxu3  ;;  %v1525_v8 = vpop.f32.mrf.mxu0 }
 0x112   :  { %v1458_v25 = vadd.f32 %v1457_v23, %v1444_v22 }
 0x113   :  { %2022 = vmatpush.bf16.msra.mxu0 %v3222_v53 }
 0x114   :  { %v1472_v28 = vadd.f32 %v1471_v20, %v1458_v25  ;;  %v3171_v25 = vld [vmem:[%s5359_s2 + $0x88] sm:$0xf0] }
 0x116   :  { %v1485_v30 = vpop.f32.mrf.mxu2 }
 0x117   :  { %v1486_v33 = vadd.f32 %v1485_v30, %v1472_v28  ;;  %2023 = vmatpush.bf16.msra.mxu0 %v3214_v61 }
 0x119   :  { %v1527_v40 = vpop.f32.mrf.mxu0 }
 0x11b   :  { %2024 = vmatpush.bf16.msra.mxu0 %v3206_v3 }
 0x11f   :  { %2025 = vmatpush.bf16.msra.mxu0 %v3198_v10 }
 0x123   :  { %2026 = vmatpush.bf16.msra.mxu0 %v3190_v15 }
 0x125   :  { %v1553_v62 = vpop.f32.mrf.mxu0 }
 0x126   :  { %v1497_v26 = vpop.f32.mrf.mxu1 }
 0x127   :  { %v1498_v31 = vadd.f32 %v1497_v26, %v1484_v27  ;;  %2027 = vmatpush.bf16.msra.mxu0 %v3182_v21  ;;  %v3174_v26 = vor.u32 %v3583_v24, %v3171_v25 }
 0x129   :  { %v1511_v29 = vpop.f32.mrf.mxu3 }
 0x12a   :  { %v1512_v35 = vadd.f32 %v1511_v29, %v1498_v31 }
 0x12b   :  { %2028 = vmatpush.bf16.msra.mxu0 %v3174_v26 }
 0x12c   :  { %v1526_v43 = vadd.f32 %v1525_v8, %v1512_v35 }
 0x12d   :  { %v1555_v14 = vpop.f32.mrf.mxu0 }
 0x12e   :  { %v1499_v36 = vpop.f32.mrf.mxu1  ;;  %v1630_v42 = vmax.f32 %v1526_v43, 0.0  ;;  %v1539_v57 = vpop.f32.mrf.mxu2 }
 0x12f   :  { %v1500_v32 = vadd.f32 %v1499_v36, %v1486_v33  ;;  %v1540_v12 = vadd.f32 %v1539_v57, %v247_v5  ;;  %v3666_v57 = vmov 65535  }
 0x130   :  { %v2179_v58 = vsel %vm2177_vm3, 4294967295, %v3666_v57 }
 0x131   :  { %v1513_v60 = vpop.f32.mrf.mxu3  ;;  %v1554_v55 = vadd.f32 %v1553_v62, %v1540_v12  ;;  %v2180_v59 = vsel %vm2178_vm4, %v2179_v58, 0  ;;  %v3626_v62 = vld [vmem:[%s5360_s3 + $0x58] sm:$0xff] }
 0x132   :  { %v1514_v45 = vadd.f32 %v1513_v60, %v1500_v32 }
 0x134   :  { %v1528_v48 = vadd.f32 %v1527_v40, %v1514_v45  ;;  %v3622_v45 = vld [vmem:[%s5360_s3 + $0x38] sm:$0xff] }
 0x136   :  { %v1634_v52 = vmax.f32 %v1528_v48, 0.0  ;;  %v1541_v9 = vpop.f32.mrf.mxu2  ;;  %v3619_v48 = vld [vmem:[%s5360_s3 + $0x20] sm:$0xff] }
 0x137   :  { %v1542_v17 = vadd.f32 %v1541_v9, %v247_v5  ;;  %v1691_v5 = vperm.slane %v1689_v2, 0 }
 0x138   :  { %v1638_v56 = vpack.c.bf16 %v1634_v52, %v1630_v42  ;;  %v2093_v42 = vld [vmem:[%s5360_s3 + $0x60] sm:$0x3] }
 0x139   :  { %v1556_v22 = vadd.f32 %v1555_v14, %v1542_v17  ;;  %v3615_v52 = vld [vmem:[%s5360_s3] sm:$0xff]  ;;  %v2147_v53 = vunpack.c.l.b16 %v2093_v42 }
 0x13a   :  { %1987 = vmatmul.bf16.vlgmr.msrb.gmra.mxu2 %v1638_v56  ;;  %2043 = vmatmul.bf16.vlgmr.msrb.gmra.mxu1 %v1638_v56  ;;  %v3627_v42 = vld [vmem:[%s5361_s4] sm:$0xff] }
 0x13b   :  { %2184 = vmatpush.bf16.msrb.mxu2 %v3622_v45  ;;  %v2160_v56 = vpack.c.b16 %v2147_v53, %v2147_v53 }
 0x13d   :  { %v2182_v61 = vand.u32 %v2180_v59, %v2160_v56  ;;  %v3638_v56 = vld [vmem:[%s5362_s5 + $0x6] ss:$0 sm:$0xff] }
 0x13f   :  { %2185 = vmatpush.bf16.msrb.mxu2 %v3621_v46  ;;  %2201 = vmatpush.bf16.msra.mxu3 %v2182_v61 }
 0x143   :  { %2186 = vmatpush.bf16.msrb.mxu2 %v3620_v37  ;;  %2202 = vmatpush.bf16.msra.mxu3 %v3626_v62  ;;  %v3632_v37 = vld [vmem:[%s5361_s4 + $0x28] sm:$0xff] }
 0x145   :  { %v1609_v27 = vpop.f32.mrf.mxu0 }
 0x146   :  { %v1567_v11 = vpop.f32.mrf.mxu1 }
 0x147   :  { %v1568_v23 = vadd.f32 %v1567_v11, %v1554_v55  ;;  %2187 = vmatpush.bf16.msrb.mxu2 %v3619_v48  ;;  %2203 = vmatpush.bf16.msra.mxu3 %v3625_v0  ;;  %v3631_v48 = vld [vmem:[%s5361_s4 + $0x20] sm:$0xff] }
 0x149   :  { %v1581_v16 = vpop.f32.mrf.mxu3 }
 0x14a   :  { %v1582_v29 = vadd.f32 %v1581_v16, %v1568_v23 }
 0x14b   :  { %2204 = vmatpush.bf16.msra.mxu3 %v3624_v4 }
 0x14d   :  { %v1611_v38 = vpop.f32.mrf.mxu0 }
 0x14e   :  { %v1595_v20 = vpop.f32.mrf.mxu2  ;;  %v1569_v50 = vpop.f32.mrf.mxu1 }
 0x14f   :  { %v1570_v8 = vadd.f32 %v1569_v50, %v1556_v22  ;;  %v1596_v34 = vadd.f32 %v1595_v20, %v1582_v29  ;;  %2205 = vmatpush.bf16.msra.mxu3 %v3623_v6  ;;  %v1692_v50 = vperm.slane %v1689_v2, 1 }
 0x151   :  { %v1583_v28 = vpop.f32.mrf.mxu3  ;;  %v1610_v36 = vadd.f32 %v1609_v27, %v1596_v34 }
 0x152   :  { %v1584_v30 = vadd.f32 %v1583_v28, %v1570_v8 }
 0x156   :  { %v1597_v31 = vpop.f32.mrf.mxu2  ;;  %v1623_v33 = vpop.f32.mrf.mxu1 }
 0x157   :  { %v1598_v35 = vadd.f32 %v1597_v31, %v1584_v30  ;;  %v1624_v39 = vadd.f32 %v1623_v33, %v1610_v36 }
 0x159   :  { %v1612_v32 = vadd.f32 %v1611_v38, %v1598_v35  ;;  %v1631_v54 = vmax.f32 %v1624_v39, 0.0 }
 0x15e   :  { %v1625_v60 = vpop.f32.mrf.mxu1 }
 0x15f   :  { %v1626_v40 = vadd.f32 %v1625_v60, %v1612_v32 }
 0x161   :  { %v1635_v41 = vmax.f32 %v1626_v40, 0.0  ;;  %v2227_v40 = vld [vmem:[%s5361_s4 + $0x30] sm:$0x1] }
 0x163   :  { %v1639_v43 = vpack.c.bf16 %v1635_v41, %v1631_v54  ;;  %v2257_v54 = vunpack.c.l.b16 %v2227_v40 }
 0x165   :  { %3295 = vmatmul.msk.bf16.vlgmr.msrb.gmra.mxu0 %vm1940_vm2, %v1639_v43  ;;  %3296 = vmatmul.msk.bf16.vlgmr.msra.gmra.mxu2 %vm1940_vm2, %v1639_v43  ;;  %v2264_v41 = vpack.c.b16 %v2257_v54, %v2257_v54  ;;  %v3667_v43 = vmov 0  }
 0x166   :  { %v2276_v45 = vsel %vm2177_vm3, 65535, %v3667_v43 }
 0x167   :  { %v2278_v46 = vand.u32 %v2276_v45, %v2264_v41 }
 0x169   :  { %v1960_v63 = vpop.f32.mrf.mxu3  ;;  %2281 = vmatpush.bf16.msrb.mxu0 %v2278_v46 }
 0x16a   :  { %v1961_v10 = vadd.f32 %v1960_v63, %v1691_v5 }
 0x16d   :  { %2282 = vmatpush.bf16.msrb.mxu0 %v3632_v37 }
 0x171   :  { %v1962_v7 = vpop.f32.mrf.mxu3  ;;  %2283 = vmatpush.bf16.msrb.mxu0 %v3631_v48 }
 0x172   :  { %v1963_v12 = vadd.f32 %v1962_v7, %v1691_v5 }
 0x175   :  { %2029 = vmatmul.bf16.vlgmr.msra.gmra.mxu0 %v5164_v44  ;;  %v3618_v44 = vld [vmem:[%s5360_s3 + $0x18] sm:$0xff] }
 0x176   :  { %2188 = vmatpush.bf16.msrb.mxu2 %v3618_v44  ;;  %v3630_v44 = vld [vmem:[%s5361_s4 + $0x18] sm:$0xff] }
 0x177   :  { %2284 = vmatpush.bf16.msrb.mxu0 %v3630_v44 }
 0x17a   :  { %2189 = vmatpush.bf16.msrb.mxu2 %v3617_v49  ;;  %v3629_v49 = vld [vmem:[%s5361_s4 + $0x10] sm:$0xff] }
 0x17b   :  { %2285 = vmatpush.bf16.msrb.mxu0 %v3629_v49 }
 0x17e   :  { %2190 = vmatpush.bf16.msrb.mxu2 %v3616_v51  ;;  %v3628_v51 = vld [vmem:[%s5361_s4 + $0x8] sm:$0xff] }
 0x17f   :  { %2286 = vmatpush.bf16.msrb.mxu0 %v3628_v51 }
 0x182   :  { %2191 = vmatpush.bf16.msrb.mxu2 %v3615_v52 }
 0x183   :  { %2287 = vmatpush.bf16.msrb.mxu0 %v3627_v42 }
 0x189   :  { %v2016_v19 = vpop.f32.mrf.mxu3 }
 0x18a   :  { %v2017_v25 = vadd.f32 %v2016_v19, %v1692_v50 }
 0x18b   :  { %v1974_v1 = vpop.f32.mrf.mxu1 }
 0x18c   :  { %v1975_v13 = vadd.f32 %v1974_v1, %v1961_v10 }
 0x191   :  { %v2018_v27 = vpop.f32.mrf.mxu3 }
 0x192   :  { %v2019_v28 = vadd.f32 %v2018_v27, %v1692_v50 }
 0x193   :  { %v1976_v11 = vpop.f32.mrf.mxu1 }
 0x194   :  { %v1977_v14 = vadd.f32 %v1976_v11, %v1963_v12 }
 0x1b7   :  { %v2044_v23 = vpop.f32.mrf.mxu1 }
 0x1bd   :  { %v1988_v3 = vpop.f32.mrf.mxu2 }
 0x1be   :  { %v1989_v15 = vadd.f32 %v1988_v3, %v1975_v13  ;;  %v3639_v3 = vld [vmem:[%s5362_s5 + $0x7] ss:$0 sm:$0xff] }
 0x1bf   :  { %v2046_v33 = vpop.f32.mrf.mxu1 }
 0x1c5   :  { %v1990_v47 = vpop.f32.mrf.mxu2 }
 0x1c6   :  { %v1991_v16 = vadd.f32 %v1990_v47, %v1977_v14 }
 0x1e2   :  { %v2002_v9 = vpop.f32.mrf.mxu0 }
 0x1e3   :  { %v2003_v55 = vadd.f32 %v2002_v9, %v1989_v15 }
 0x1e5   :  { %v2063_v20 = vmax.f32 %v2003_v55, 0.0 }
 0x1e8   :  { %v2058_v26 = vpop.f32.mrf.mxu2 }
 0x1ea   :  { %v2004_v17 = vpop.f32.mrf.mxu0 }
 0x1eb   :  { %v2005_v18 = vadd.f32 %v2004_v17, %v1991_v16 }
 0x1ed   :  { %v2065_v21 = vmax.f32 %v2005_v18, 0.0 }
 0x1ef   :  { %v2067_v22 = vpack.c.bf16 %v2065_v21, %v2063_v20 }
 0x1f0   :  { %v2060_v36 = vpop.f32.mrf.mxu2 }
 0x1f1   :  { %2192 = vmatmul.bf16.vlgmr.msrb.gmra.mxu2 %v2067_v22 }
 0x1f2   :  { %v2030_v24 = vpop.f32.mrf.mxu0 }
 0x1f3   :  { %v2031_v8 = vadd.f32 %v2030_v24, %v2017_v25 }
 0x1f5   :  { %v2045_v29 = vadd.f32 %v2044_v23, %v2031_v8 }
 0x1f7   :  { %v2059_v34 = vadd.f32 %v2058_v26, %v2045_v29 }
 0x1f9   :  { %v2064_v32 = vmax.f32 %v2059_v34, 0.0 }
 0x1fa   :  { %v2032_v30 = vpop.f32.mrf.mxu0 }
 0x1fb   :  { %v2033_v31 = vadd.f32 %v2032_v30, %v2019_v28 }
 0x1fd   :  { %v2047_v35 = vadd.f32 %v2046_v33, %v2033_v31 }
 0x1ff   :  { %v2061_v38 = vadd.f32 %v2060_v36, %v2047_v35 }
 0x201   :  { %v2066_v39 = vmax.f32 %v2061_v38, 0.0 }
 0x203   :  { %v2068_v60 = vpack.c.bf16 %v2066_v39, %v2064_v32 }
 0x205   :  { %3345 = vmatmul.msk.bf16.vlgmr.msra.gmra.mxu3 %vm2173_vm5, %v2068_v60 }
 0x274   :  { %v2193_v52 = vpop.f32.mrf.mxu2 }
 0x275   :  { %v2194_v58 = vadd.f32 %v3638_v56, %v2193_v52 }
 0x27c   :  { %v2195_v57 = vpop.f32.mrf.mxu2 }
 0x27d   :  { %v2196_v59 = vadd.f32 %v3638_v56, %v2195_v57 }
 0x288   :  { %v2207_v53 = vpop.f32.mrf.mxu3 }
 0x289   :  { %v2208_v61 = vadd.f32 %v2207_v53, %v2194_v58 }
 0x28b   :  { %v2212_v0 = vmax.f32 %v2208_v61, 0.0 }
 0x290   :  { %v2209_v62 = vpop.f32.mrf.mxu3 }
 0x291   :  { %v2210_v63 = vadd.f32 %v2209_v62, %v2196_v59 }
 0x293   :  { %v2213_v1 = vmax.f32 %v2210_v63, 0.0 }
 0x295   :  { %v2214_v2 = vpack.c.bf16 %v2213_v1, %v2212_v0 }
 0x297   :  { %3370 = vmatmul.msk.bf16.vlgmr.msrb.gmra.mxu0 %vm2271_vm6, %v2214_v2 }
 0x314   :  { %v2289_v4 = vpop.f32.mrf.mxu0 }
 0x315   :  { %v2290_v5 = vadd.f32 %v3639_v3, %v2289_v4 }
 0x317   :  { %2295 = vst.msk [vmem:[#allocation2] sm:$0xff] %vm2294_vm7, %v2290_v5 }
 0x31c   :  { %v2291_v6 = vpop.f32.mrf.mxu0 }
 0x31d   :  { %v2292_v7 = vadd.f32 %v3639_v3, %v2291_v6 }
 0x31f   :  { %2296 = vst.msk [vmem:[#allocation2 + $0x8] sm:$0xff] %vm2294_vm7, %v2292_v7 }
 0x320   :  { %2309 = dma.vmem_to_hbm [thread:$0]  %s2302_s25, 256, %s2304_s28, [#allocation3], %s3669_s29, %s3669_s29, %s3670_s30  }
 0x321   :  { %3664 = dma.done.wait [#allocation3], 256  }
 0x322   :  { %3665 = vsyncadd [#allocation3], 4294967040 }
 0x323   :  { %2314 = vsyncpa [#allocation3], 1 }

</bundles_post_ra>
